<compile_context>
chip_gen: v7x
topology: tpu7x:2x2x1
jax: 0.10.0
libtpu: 0.0.40
codegen_flags: <defaults>
</compile_context>

<pallas_src>
import math
import numpy as np
import jax
import jax.numpy as jnp
from jax import lax
from jax.experimental import pallas as pl
from jax.experimental.pallas import tpu as pltpu

# ---------------- synthetic GPT-2 / model config (small shapes) ----------------
VOCAB = 64
N_EMBD = 32                       # gpt_embedding_size
N_HEAD = 4
HEAD_DIM = N_EMBD // N_HEAD       # 8
N_LAYER = 2
N_POS = 64
PREFIX_LENGTH = 4                 # <= 10 -> clip_project is the MLP (Linear, Tanh, Linear) branch
PREFIX_SIZE = 16
SEQ_LEN = 8
BATCH = 2
TOTAL_T = PREFIX_LENGTH + SEQ_LEN # 12
N_ROWS = BATCH * TOTAL_T          # 24   (batch folded into rows)
LN_EPS = 1e-5
HIDDEN_CP = N_EMBD * PREFIX_LENGTH // 2   # 64
OUT_CP = N_EMBD * PREFIX_LENGTH           # 128
LOGIT_PAD = 128                   # lane-dense padded vocab width (V=64 -> pad to 128)
SLAB_W = 128                      # all parameter slabs are 128 lanes wide (lane-dense)

FULL_VMEM = pl.BlockSpec(memory_space=pltpu.MemorySpace.VMEM)


# ---------------- static kernel-row permutation (baked into constants at pack time) -----------
def _row_perm():
    """kernel row k -> logical row (b * TOTAL_T + t)."""
    perm = np.empty(N_ROWS, np.int64)
    i = 0
    # prefix block: p-major, then batch (matches the 4 column slices of the clip_project output)
    for p in range(PREFIX_LENGTH):
        for b_ in range(BATCH):
            perm[i] = b_ * TOTAL_T + p
            i += 1
    # text block: batch-major, then sequence (matches the one-hot token row order)
    for b_ in range(BATCH):
        for s in range(SEQ_LEN):
            perm[i] = b_ * TOTAL_T + PREFIX_LENGTH + s
            i += 1
    return perm


ROW_PERM = _row_perm()                  # kernel row -> logical row
ROW_INV_PERM = np.argsort(ROW_PERM)     # logical row -> kernel row


# ---------------- parameter slab layout (static, shared by packer and kernel) ----------------
def _build_layout(entries, row_align):
    layout, row = {}, 0
    for name, (r, c) in entries:
        layout[name] = (row, r, c)
        row += r
        row = ((row + row_align - 1) // row_align) * row_align
    return layout, row


def _weight_entries():
    e = [("cp_w1", (PREFIX_SIZE, HIDDEN_CP)),
         ("cp_w2", (HIDDEN_CP, OUT_CP)),
         ("wte_t", (N_EMBD, LOGIT_PAD))]      # wte^T, lane-padded; used for lookup AND LM head
    for l in range(N_LAYER):
        e += [(f"w_qkv_{l}", (N_EMBD, 3 * N_EMBD)),
              (f"w_proj_{l}", (N_EMBD, N_EMBD)),
              (f"w_fc_{l}", (N_EMBD, 4 * N_EMBD)),
              (f"w_mp_t_{l}", (N_EMBD, 4 * N_EMBD))]   # stored transposed -> 128-lane dense
    return e


def _bias_entries():
    # multi-row constants first (tile-aligned starts); 1-row entries packed densely after.
    e = [("attn_bias", (N_ROWS, N_ROWS)),
         ("wpe", (N_ROWS, N_EMBD)),           # pre-tiled + permuted position embedding
         ("head_mask", (N_HEAD, N_EMBD)),
         ("cp_b1", (1, HIDDEN_CP)), ("cp_b2", (1, OUT_CP)),
         ("lnf_g", (1, N_EMBD)), ("lnf_b", (1, N_EMBD))]
    for l in range(N_LAYER):
        e += [(f"ln1_g_{l}", (1, N_EMBD)), (f"ln1_b_{l}", (1, N_EMBD)),
              (f"b_qkv_{l}", (1, 3 * N_EMBD)), (f"b_proj_{l}", (1, N_EMBD)),
              (f"ln2_g_{l}", (1, N_EMBD)), (f"ln2_b_{l}", (1, N_EMBD)),
              (f"b_fc_{l}", (1, 4 * N_EMBD)), (f"b_mp_{l}", (1, N_EMBD))]
    return e


W_LAYOUT, W_ROWS = _build_layout(_weight_entries(), 16)  # bf16 tiles are (16, 128) -> align 16
B_LAYOUT, B_ROWS = _build_layout(_bias_entries(), 1)     # densified: single rows need no align


# ---------------- in-kernel helpers (traced inside the Pallas body) ----------------
def _layer_norm(x, g, b):
    mu = jnp.mean(x, axis=-1, keepdims=True)
    var = jnp.mean((x - mu) ** 2, axis=-1, keepdims=True)
    return (x - mu) * lax.rsqrt(var + LN_EPS) * g + b


def _gelu_new(x):
    # GPT-2 "gelu_new" (tanh approximation)
    return 0.5 * x * (1.0 + jnp.tanh(math.sqrt(2.0 / math.pi) * (x + 0.044715 * x ** 3)))


# ---------------- the single fused kernel ----------------
def fused_kernel(ids_ref, prefix_ref, wslab_ref, bslab_ref, o_ref):
    f32 = jnp.float32
    bf16 = jnp.bfloat16

    def w(name):                                  # bf16 matmul weight from the weight slab
        r0, nr, nc = W_LAYOUT[name]
        return wslab_ref[r0:r0 + nr, 0:nc]

    def b(name):                                  # f32 bias / LN / constant from the bias slab
        r0, nr, nc = B_LAYOUT[name]
        return bslab_ref[r0:r0 + nr, 0:nc]

    def mm(x, wname):                             # x @ W  : bf16 on the MXU, f32 accumulate
        return jnp.dot(x.astype(bf16), w(wname), preferred_element_type=f32)

    def mm_t(x, wname):                           # x @ W^T (weight stored pre-transposed)
        return jnp.einsum("qk,ck->qc", x.astype(bf16), w(wname),
                          preferred_element_type=f32)

    # ---- token embedding lookup: lane-padded one-hot against the transposed wte slab entry ----
    ids = ids_ref[...]                                                    # (B*S, 1) int32
    iota = lax.broadcasted_iota(jnp.int32, (BATCH * SEQ_LEN, LOGIT_PAD), 1)
    onehot = (iota == ids).astype(bf16)                                   # (B*S, 128), ids < V
    text_emb = jnp.einsum("sv,cv->sc", onehot, w("wte_t"),
                          preferred_element_type=f32)                     # (B*S, C)

    # ---- clip_project MLP: Linear -> Tanh -> Linear ----
    h = jnp.tanh(mm(prefix_ref[...], "cp_w1") + b("cp_b1"))               # (B, hidden)
    proj = mm(h, "cp_w2") + b("cp_b2")                                    # (B, P*C)

    # ---- two contiguous row blocks [prefix ; text]; the static row permutation that restores
    #      the logical (batch, prefix+seq) order is baked into wpe / attn_bias at pack time and
    #      un-applied on the (24,128) output in the wrapper.  One 5-piece concat, once per call.
    x = jnp.concatenate(
        [proj[:, p * N_EMBD:(p + 1) * N_EMBD] for p in range(PREFIX_LENGTH)] + [text_emb],
        axis=0)                                                           # (N_ROWS, C)

    # ---- GPT-2 position embeddings (pre-tiled + permuted at pack time) ----
    x = x + b("wpe")                                                      # (N_ROWS, C)

    attn_bias = b("attn_bias")                                            # (N_ROWS, N_ROWS) 0/-1e9
    head_mask = b("head_mask")                                            # (H, C) 0/1 lane masks
    # NOTE: 1/sqrt(HEAD_DIM) is folded into the Q columns of w_qkv/b_qkv at pack time.

    # ---- transformer blocks (unrolled over the 2 layers) ----
    for l in range(N_LAYER):
        # --- causal self-attention via static per-head lane masks: no head split/merge relayouts.
        #     ctx = sum_h softmax(Q @ (K*mask_h)^T + bias) @ (V*mask_h)  ==  concat_h(head_h out)
        h1 = _layer_norm(x, b(f"ln1_g_{l}"), b(f"ln1_b_{l}"))
        qkv = mm(h1, f"w_qkv_{l}") + b(f"b_qkv_{l}")                      # (N_ROWS, 3C), Q scaled
        q = qkv[:, 0:N_EMBD].astype(bf16)
        k = qkv[:, N_EMBD:2 * N_EMBD]
        v = qkv[:, 2 * N_EMBD:3 * N_EMBD]

        ctx = None
        for hh in range(N_HEAD):
            msk = head_mask[hh:hh + 1, :]                                 # (1, C)
            s = jnp.einsum("qc,kc->qk", q, (k * msk).astype(bf16),
                           preferred_element_type=f32)                    # (N_ROWS, N_ROWS)
            s = s + attn_bias                                             # block-diag causal
            s = s - jnp.max(s, axis=-1, keepdims=True)
            p = jnp.exp(s)
            p = p * pl.reciprocal(jnp.sum(p, axis=-1, keepdims=True), approx=True)
            pv = jnp.dot(p.astype(bf16), (v * msk).astype(bf16),
                         preferred_element_type=f32)                      # only head-h cols != 0
            ctx = pv if ctx is None else ctx + pv                         # (N_ROWS, C)
        x = x + mm(ctx, f"w_proj_{l}") + b(f"b_proj_{l}")

        # --- MLP ---
        h2 = _layer_norm(x, b(f"ln2_g_{l}"), b(f"ln2_b_{l}"))
        fc = _gelu_new(mm(h2, f"w_fc_{l}") + b(f"b_fc_{l}"))              # (N_ROWS, 4C)
        x = x + mm_t(fc, f"w_mp_t_{l}") + b(f"b_mp_{l}")

    # ---- final LayerNorm + tied LM head; lane-dense 128-wide logits store ----
    hf = _layer_norm(x, b("lnf_g"), b("lnf_b"))
    o_ref[...] = jnp.dot(hf.astype(bf16), w("wte_t"),
                         preferred_element_type=jnp.float32)              # (N_ROWS, 128)


# ---------------- ClipCaptionModel.forward ----------------
def clip_caption_forward(tokens, prefix, params, mask=None, labels=None):
    """Returns GPT-2 logits of shape (B, prefix_length + seq_len, vocab)."""
    assert mask is None, "mask path not wired"  # TODO(synk): attention_mask support
    assert labels is None                       # TODO(synk): labels -> cross-entropy loss path
    B, S = tokens.shape
    assert (B, S) == (BATCH, SEQ_LEN) and prefix.shape == (BATCH, PREFIX_SIZE)

    ids = tokens.reshape(B * S, 1).astype(jnp.int32)
    # NOTE: if this is called in a decode loop, keep params["wslab"]/["bslab"] hoisted outside the
    # loop (device-resident) so the per-call HBM->VMEM slab DMA is the only parameter traffic.
    # TODO(synk): for real GPT-2 sizes, switch to vocab-tiled out_spec / K-tiled weight streaming
    # (v7x has only 64 MiB VMEM) and add a "parallel" batch grid axis to use both v7x TensorCores.
    out = pl.pallas_call(
        fused_kernel,
        out_shape=jax.ShapeDtypeStruct((N_ROWS, LOGIT_PAD), jnp.float32),
        in_specs=[FULL_VMEM, FULL_VMEM, FULL_VMEM, FULL_VMEM],
        out_specs=FULL_VMEM,
    )(ids, prefix, params["wslab"], params["bslab"])
    # un-permute the kernel row order back to (batch, prefix+seq) and slice the real vocab
    out = out[jnp.asarray(ROW_INV_PERM, jnp.int32)]
    return out[:, :VOCAB].reshape(B, TOTAL_T, VOCAB)


# ---------------- deterministic parameter init + slab packing ----------------
def _pack_slab(layout, total_rows, tensors, dtype):
    slab = jnp.zeros((total_rows, SLAB_W), dtype)
    for name, arr in tensors.items():
        r0, nr, nc = layout[name]
        arr = jnp.asarray(arr)
        assert arr.shape == (nr, nc), (name, arr.shape, (nr, nc))
        slab = slab.at[r0:r0 + nr, 0:nc].set(arr.astype(dtype))
    return slab


def pack_params(raw):
    C = N_EMBD
    pos = ROW_PERM % TOTAL_T
    bid = ROW_PERM // TOTAL_T

    # tied LM head / embedding table: wte^T, lane-padded to 128 (padded cols -> 0 logits)
    wte_t = np.zeros((C, LOGIT_PAD), np.float32)
    wte_t[:, :VOCAB] = np.asarray(raw["wte"]).T

    # block-diagonal causal additive mask, in (permuted) kernel row order
    ok = (bid[:, None] == bid[None, :]) & (pos[None, :] <= pos[:, None])
    attn_bias = np.where(ok, 0.0, -1e9).astype(np.float32)

    # position embedding pre-tiled to kernel rows (positions 0..T-1 per batch, permuted)
    wpe_rows = np.asarray(raw["wpe"])[pos].astype(np.float32)

    # static per-head lane masks over the C=32 channels
    head_mask = (np.arange(C)[None, :] // HEAD_DIM ==
                 np.arange(N_HEAD)[:, None]).astype(np.float32)

    wt = {"cp_w1": raw["cp_w1"], "cp_w2": raw["cp_w2"], "wte_t": wte_t}
    bt = {"cp_b1": raw["cp_b1"], "cp_b2": raw["cp_b2"],
          "wpe": wpe_rows, "head_mask": head_mask,
          "lnf_g": raw["lnf_g"], "lnf_b": raw["lnf_b"],
          "attn_bias": attn_bias}

    inv_scale = 1.0 / math.sqrt(HEAD_DIM)
    for l, lp in enumerate(raw["layers"]):
        w_qkv = np.asarray(lp["w_qkv"]).copy()
        b_qkv = np.asarray(lp["b_qkv"]).copy()
        w_qkv[:, :C] *= inv_scale          # fold the attention scale into Q at pack time
        b_qkv[:, :C] *= inv_scale
        wt[f"w_qkv_{l}"] = w_qkv
        wt[f"w_proj_{l}"] = lp["w_proj"]
        wt[f"w_fc_{l}"] = lp["w_fc"]
        wt[f"w_mp_t_{l}"] = np.asarray(lp["w_mp"]).T     # store transposed: (C, 4C), lane-dense
        bt[f"b_qkv_{l}"] = b_qkv
        bt[f"b_proj_{l}"] = lp["b_proj"]
        bt[f"ln1_g_{l}"] = lp["ln1_g"]; bt[f"ln1_b_{l}"] = lp["ln1_b"]
        bt[f"ln2_g_{l}"] = lp["ln2_g"]; bt[f"ln2_b_{l}"] = lp["ln2_b"]
        bt[f"b_fc_{l}"] = lp["b_fc"];   bt[f"b_mp_{l}"] = lp["b_mp"]
    return {
        "wslab": _pack_slab(W_LAYOUT, W_ROWS, wt, jnp.bfloat16),   # MXU weights in bf16
        "bslab": _pack_slab(B_LAYOUT, B_ROWS, bt, jnp.float32),    # biases/LN/pos/mask in f32
    }


def init_params(key):
    ks = iter(jax.random.split(key, 64))

    def nrm(shape, scale=0.02):
        return scale * jax.random.normal(next(ks), shape, jnp.float32)

    C = N_EMBD
    raw = {
        # clip_project = MLP((prefix_size, C*P//2, C*P)) : Linear, Tanh, Linear
        "cp_w1": nrm((PREFIX_SIZE, HIDDEN_CP)), "cp_b1": nrm((1, HIDDEN_CP)),
        "cp_w2": nrm((HIDDEN_CP, OUT_CP)),      "cp_b2": nrm((1, OUT_CP)),
        # GPT-2 embeddings
        "wte": nrm((VOCAB, C)),
        "wpe": nrm((N_POS, C)),
        # final layer norm
        "lnf_g": jnp.ones((1, C), jnp.float32),
        "lnf_b": jnp.zeros((1, C), jnp.float32),
        "layers": [],
    }
    for _ in range(N_LAYER):
        raw["layers"].append({
            "ln1_g": jnp.ones((1, C), jnp.float32), "ln1_b": jnp.zeros((1, C), jnp.float32),
            "w_qkv": nrm((C, 3 * C)), "b_qkv": nrm((1, 3 * C)),
            "w_proj": nrm((C, C)),    "b_proj": nrm((1, C)),
            "ln2_g": jnp.ones((1, C), jnp.float32), "ln2_b": jnp.zeros((1, C), jnp.float32),
            "w_fc": nrm((C, 4 * C)),  "b_fc": nrm((1, 4 * C)),
            "w_mp": nrm((4 * C, C)),  "b_mp": nrm((1, C)),
        })
    return pack_params(raw)


if __name__ == "__main__":
    key = jax.random.PRNGKey(0)
    k_param, k_tok, k_pref = jax.random.split(key, 3)

    params = init_params(k_param)
    # tokens are int64 in PyTorch; JAX default has x64 disabled, so int32 (values fit).
    tokens = jax.random.randint(k_tok, (BATCH, SEQ_LEN), 0, VOCAB, dtype=jnp.int32)
    prefix = jax.random.normal(k_pref, (BATCH, PREFIX_SIZE), jnp.float32)

    logits = clip_caption_forward(tokens, prefix, params)
    logits = jax.block_until_ready(logits)

    assert logits.shape == (BATCH, PREFIX_LENGTH + SEQ_LEN, VOCAB)
    assert bool(jnp.all(jnp.isfinite(logits)))
    print("KERNEL_OK")
</pallas_src>

<mosaic_0001>
module attributes {stable_mosaic.version = 11 : i64} {
  func.func @fused_kernel(%arg0: memref<16x1xi32, #tpu.memory_space<vmem>>, %arg1: memref<2x16xf32, #tpu.memory_space<vmem>>, %arg2: memref<368x128xbf16, #tpu.memory_space<vmem>>, %arg3: memref<72x128xf32, #tpu.memory_space<vmem>>, %arg4: memref<24x128xf32, #tpu.memory_space<vmem>>) attributes {dimension_semantics = [], scalar_prefetch = 0 : i64, scratch_operands = 0 : i64, tpu.core_type = #tpu.core_type<tc>} {
    %c0 = arith.constant 0 : index
    %c0_0 = arith.constant 0 : index
    %0 = vector.load %arg0[%c0, %c0_0] : memref<16x1xi32, #tpu.memory_space<vmem>>, vector<16x1xi32>
    %1 = tpu.iota {dimensions = array<i32: 1>} : vector<16x128xi32>
    %2 = vector.broadcast %0 : vector<16x1xi32> to vector<16x128xi32>
    %3 = arith.cmpi eq, %1, %2 : vector<16x128xi32>
    %4 = arith.extui %3 : vector<16x128xi1> to vector<16x128xi32>
    %5 = arith.sitofp %4 : vector<16x128xi32> to vector<16x128xf32>
    %6 = arith.truncf %5 : vector<16x128xf32> to vector<16x128xbf16>
    %c80 = arith.constant 80 : index
    %c0_1 = arith.constant 0 : index
    %7 = vector.load %arg2[%c80, %c0_1] : memref<368x128xbf16, #tpu.memory_space<vmem>>, vector<32x128xbf16>
    "tpu.trace_start"() <{level = 10 : i32, message = "sv,cv->sc"}> : () -> ()
    %cst = arith.constant dense<0.000000e+00> : vector<16x32xf32>
    %8 = tpu.matmul %6, %7, %cst {dimension_numbers = #tpu.dot_dimension_numbers<[1], [1], [0], [0], [0, 0, 1, 0], [], []>} : vector<16x128xbf16>, vector<32x128xbf16>, vector<16x32xf32> -> vector<16x32xf32>
    "tpu.trace_stop"() : () -> ()
    %c0_2 = arith.constant 0 : index
    %c0_3 = arith.constant 0 : index
    %9 = vector.load %arg1[%c0_2, %c0_3] : memref<2x16xf32, #tpu.memory_space<vmem>>, vector<2x16xf32>
    %10 = arith.truncf %9 : vector<2x16xf32> to vector<2x16xbf16>
    %c0_4 = arith.constant 0 : index
    %c0_5 = arith.constant 0 : index
    %11 = vector.load %arg2[%c0_4, %c0_5] : memref<368x128xbf16, #tpu.memory_space<vmem>>, vector<16x64xbf16>
    %cst_6 = arith.constant dense<0.000000e+00> : vector<2x64xf32>
    %12 = tpu.matmul %10, %11, %cst_6 {dimension_numbers = #tpu.dot_dimension_numbers<[1], [0], [0], [1], [0, 0, 1, 1], [], []>} : vector<2x16xbf16>, vector<16x64xbf16>, vector<2x64xf32> -> vector<2x64xf32>
    %c52 = arith.constant 52 : index
    %c0_7 = arith.constant 0 : index
    %13 = vector.load %arg3[%c52, %c0_7] : memref<72x128xf32, #tpu.memory_space<vmem>>, vector<1x64xf32>
    %14 = vector.broadcast %13 : vector<1x64xf32> to vector<2x64xf32>
    %15 = arith.addf %12, %14 : vector<2x64xf32>
    %16 = math.tanh %15 : vector<2x64xf32>
    %17 = arith.truncf %16 : vector<2x64xf32> to vector<2x64xbf16>
    %c16 = arith.constant 16 : index
    %c0_8 = arith.constant 0 : index
    %18 = vector.load %arg2[%c16, %c0_8] : memref<368x128xbf16, #tpu.memory_space<vmem>>, vector<64x128xbf16>
    %cst_9 = arith.constant dense<0.000000e+00> : vector<2x128xf32>
    %19 = tpu.matmul %17, %18, %cst_9 {dimension_numbers = #tpu.dot_dimension_numbers<[1], [0], [0], [1], [0, 0, 1, 1], [], []>} : vector<2x64xbf16>, vector<64x128xbf16>, vector<2x128xf32> -> vector<2x128xf32>
    %c53 = arith.constant 53 : index
    %c0_10 = arith.constant 0 : index
    %20 = vector.load %arg3[%c53, %c0_10] : memref<72x128xf32, #tpu.memory_space<vmem>>, vector<1x128xf32>
    %21 = vector.broadcast %20 : vector<1x128xf32> to vector<2x128xf32>
    %22 = arith.addf %19, %21 : vector<2x128xf32>
    %23 = vector.extract_strided_slice %22 {offsets = [0, 0], sizes = [2, 32], strides = [1, 1]} : vector<2x128xf32> to vector<2x32xf32>
    %24 = vector.extract_strided_slice %22 {offsets = [0, 32], sizes = [2, 32], strides = [1, 1]} : vector<2x128xf32> to vector<2x32xf32>
    %25 = vector.extract_strided_slice %22 {offsets = [0, 64], sizes = [2, 32], strides = [1, 1]} : vector<2x128xf32> to vector<2x32xf32>
    %26 = vector.extract_strided_slice %22 {offsets = [0, 96], sizes = [2, 32], strides = [1, 1]} : vector<2x128xf32> to vector<2x32xf32>
    %27 = tpu.concatenate %23, %24, %25, %26, %8 in 0 : vector<2x32xf32>, vector<2x32xf32>, vector<2x32xf32>, vector<2x32xf32>, vector<16x32xf32> -> vector<24x32xf32>
    %c24 = arith.constant 24 : index
    %c0_11 = arith.constant 0 : index
    %28 = vector.load %arg3[%c24, %c0_11] : memref<72x128xf32, #tpu.memory_space<vmem>>, vector<24x32xf32>
    %29 = arith.addf %27, %28 : vector<24x32xf32>
    %c0_12 = arith.constant 0 : index
    %c0_13 = arith.constant 0 : index
    %30 = vector.load %arg3[%c0_12, %c0_13] : memref<72x128xf32, #tpu.memory_space<vmem>>, vector<24x24xf32>
    %c48 = arith.constant 48 : index
    %c0_14 = arith.constant 0 : index
    %31 = vector.load %arg3[%c48, %c0_14] : memref<72x128xf32, #tpu.memory_space<vmem>>, vector<4x32xf32>
    %c56 = arith.constant 56 : index
    %c0_15 = arith.constant 0 : index
    %32 = vector.load %arg3[%c56, %c0_15] : memref<72x128xf32, #tpu.memory_space<vmem>>, vector<1x32xf32>
    %c57 = arith.constant 57 : index
    %c0_16 = arith.constant 0 : index
    %33 = vector.load %arg3[%c57, %c0_16] : memref<72x128xf32, #tpu.memory_space<vmem>>, vector<1x32xf32>
    %cst_17 = arith.constant dense<0.000000e+00> : vector<24xf32>
    %34 = vector.multi_reduction <add>, %29, %cst_17 [1] : vector<24x32xf32> to vector<24xf32>
    %35 = vector.shape_cast %34 : vector<24xf32> to vector<24x1xf32>
    %cst_18 = arith.constant 3.200000e+01 : f32
    %36 = vector.broadcast %cst_18 : f32 to vector<24x1xf32>
    %37 = arith.divf %35, %36 : vector<24x1xf32>
    %38 = vector.broadcast %37 : vector<24x1xf32> to vector<24x32xf32>
    %39 = arith.subf %29, %38 : vector<24x32xf32>
    %40 = arith.mulf %39, %39 : vector<24x32xf32>
    %cst_19 = arith.constant dense<0.000000e+00> : vector<24xf32>
    %41 = vector.multi_reduction <add>, %40, %cst_19 [1] : vector<24x32xf32> to vector<24xf32>
    %42 = vector.shape_cast %41 : vector<24xf32> to vector<24x1xf32>
    %cst_20 = arith.constant 3.200000e+01 : f32
    %43 = vector.broadcast %cst_20 : f32 to vector<24x1xf32>
    %44 = arith.divf %42, %43 : vector<24x1xf32>
    %45 = vector.broadcast %37 : vector<24x1xf32> to vector<24x32xf32>
    %46 = arith.subf %29, %45 : vector<24x32xf32>
    %cst_21 = arith.constant 9.99999974E-6 : f32
    %47 = vector.broadcast %cst_21 : f32 to vector<24x1xf32>
    %48 = arith.addf %44, %47 : vector<24x1xf32>
    %49 = math.rsqrt %48 : vector<24x1xf32>
    %50 = vector.broadcast %49 : vector<24x1xf32> to vector<24x32xf32>
    %51 = arith.mulf %46, %50 : vector<24x32xf32>
    %52 = vector.broadcast %32 : vector<1x32xf32> to vector<24x32xf32>
    %53 = arith.mulf %51, %52 : vector<24x32xf32>
    %54 = vector.broadcast %33 : vector<1x32xf32> to vector<24x32xf32>
    %55 = arith.addf %53, %54 : vector<24x32xf32>
    %56 = arith.truncf %55 : vector<24x32xf32> to vector<24x32xbf16>
    %c112 = arith.constant 112 : index
    %c0_22 = arith.constant 0 : index
    %57 = vector.load %arg2[%c112, %c0_22] : memref<368x128xbf16, #tpu.memory_space<vmem>>, vector<32x96xbf16>
    %cst_23 = arith.constant dense<0.000000e+00> : vector<24x96xf32>
    %58 = tpu.matmul %56, %57, %cst_23 {dimension_numbers = #tpu.dot_dimension_numbers<[1], [0], [0], [1], [0, 0, 1, 1], [], []>} : vector<24x32xbf16>, vector<32x96xbf16>, vector<24x96xf32> -> vector<24x96xf32>
    %c58 = arith.constant 58 : index
    %c0_24 = arith.constant 0 : index
    %59 = vector.load %arg3[%c58, %c0_24] : memref<72x128xf32, #tpu.memory_space<vmem>>, vector<1x96xf32>
    %60 = vector.broadcast %59 : vector<1x96xf32> to vector<24x96xf32>
    %61 = arith.addf %58, %60 : vector<24x96xf32>
    %62 = vector.extract_strided_slice %61 {offsets = [0, 0], sizes = [24, 32], strides = [1, 1]} : vector<24x96xf32> to vector<24x32xf32>
    %63 = arith.truncf %62 : vector<24x32xf32> to vector<24x32xbf16>
    %64 = vector.extract_strided_slice %61 {offsets = [0, 32], sizes = [24, 32], strides = [1, 1]} : vector<24x96xf32> to vector<24x32xf32>
    %65 = vector.extract_strided_slice %61 {offsets = [0, 64], sizes = [24, 32], strides = [1, 1]} : vector<24x96xf32> to vector<24x32xf32>
    %66 = vector.extract_strided_slice %31 {offsets = [0, 0], sizes = [1, 32], strides = [1, 1]} : vector<4x32xf32> to vector<1x32xf32>
    %67 = vector.broadcast %66 : vector<1x32xf32> to vector<24x32xf32>
    %68 = arith.mulf %64, %67 : vector<24x32xf32>
    %69 = arith.truncf %68 : vector<24x32xf32> to vector<24x32xbf16>
    "tpu.trace_start"() <{level = 10 : i32, message = "qc,kc->qk"}> : () -> ()
    %cst_25 = arith.constant dense<0.000000e+00> : vector<24x24xf32>
    %70 = tpu.matmul %63, %69, %cst_25 {dimension_numbers = #tpu.dot_dimension_numbers<[1], [1], [0], [0], [0, 0, 1, 0], [], []>} : vector<24x32xbf16>, vector<24x32xbf16>, vector<24x24xf32> -> vector<24x24xf32>
    "tpu.trace_stop"() : () -> ()
    %71 = arith.addf %70, %30 : vector<24x24xf32>
    %cst_26 = arith.constant dense<0xFF800000> : vector<24xf32>
    %72 = vector.multi_reduction <maximumf>, %71, %cst_26 [1] : vector<24x24xf32> to vector<24xf32>
    %73 = vector.shape_cast %72 : vector<24xf32> to vector<24x1xf32>
    %74 = vector.broadcast %73 : vector<24x1xf32> to vector<24x24xf32>
    %75 = arith.subf %71, %74 : vector<24x24xf32>
    %76 = math.exp %75 : vector<24x24xf32>
    %cst_27 = arith.constant dense<0.000000e+00> : vector<24xf32>
    %77 = vector.multi_reduction <add>, %76, %cst_27 [1] : vector<24x24xf32> to vector<24xf32>
    %78 = vector.shape_cast %77 : vector<24xf32> to vector<24x1xf32>
    %79 = tpu.reciprocal %78 {approx = true} : vector<24x1xf32> -> vector<24x1xf32>
    %80 = vector.broadcast %79 : vector<24x1xf32> to vector<24x24xf32>
    %81 = arith.mulf %76, %80 : vector<24x24xf32>
    %82 = arith.truncf %81 : vector<24x24xf32> to vector<24x24xbf16>
    %83 = vector.broadcast %66 : vector<1x32xf32> to vector<24x32xf32>
    %84 = arith.mulf %65, %83 : vector<24x32xf32>
    %85 = arith.truncf %84 : vector<24x32xf32> to vector<24x32xbf16>
    %cst_28 = arith.constant dense<0.000000e+00> : vector<24x32xf32>
    %86 = tpu.matmul %82, %85, %cst_28 {dimension_numbers = #tpu.dot_dimension_numbers<[1], [0], [0], [1], [0, 0, 1, 1], [], []>} : vector<24x24xbf16>, vector<24x32xbf16>, vector<24x32xf32> -> vector<24x32xf32>
    %87 = vector.extract_strided_slice %31 {offsets = [1, 0], sizes = [1, 32], strides = [1, 1]} : vector<4x32xf32> to vector<1x32xf32>
    %88 = vector.broadcast %87 : vector<1x32xf32> to vector<24x32xf32>
    %89 = arith.mulf %64, %88 : vector<24x32xf32>
    %90 = arith.truncf %89 : vector<24x32xf32> to vector<24x32xbf16>
    "tpu.trace_start"() <{level = 10 : i32, message = "qc,kc->qk"}> : () -> ()
    %cst_29 = arith.constant dense<0.000000e+00> : vector<24x24xf32>
    %91 = tpu.matmul %63, %90, %cst_29 {dimension_numbers = #tpu.dot_dimension_numbers<[1], [1], [0], [0], [0, 0, 1, 0], [], []>} : vector<24x32xbf16>, vector<24x32xbf16>, vector<24x24xf32> -> vector<24x24xf32>
    "tpu.trace_stop"() : () -> ()
    %92 = arith.addf %91, %30 : vector<24x24xf32>
    %cst_30 = arith.constant dense<0xFF800000> : vector<24xf32>
    %93 = vector.multi_reduction <maximumf>, %92, %cst_30 [1] : vector<24x24xf32> to vector<24xf32>
    %94 = vector.shape_cast %93 : vector<24xf32> to vector<24x1xf32>
    %95 = vector.broadcast %94 : vector<24x1xf32> to vector<24x24xf32>
    %96 = arith.subf %92, %95 : vector<24x24xf32>
    %97 = math.exp %96 : vector<24x24xf32>
    %cst_31 = arith.constant dense<0.000000e+00> : vector<24xf32>
    %98 = vector.multi_reduction <add>, %97, %cst_31 [1] : vector<24x24xf32> to vector<24xf32>
    %99 = vector.shape_cast %98 : vector<24xf32> to vector<24x1xf32>
    %100 = tpu.reciprocal %99 {approx = true} : vector<24x1xf32> -> vector<24x1xf32>
    %101 = vector.broadcast %100 : vector<24x1xf32> to vector<24x24xf32>
    %102 = arith.mulf %97, %101 : vector<24x24xf32>
    %103 = arith.truncf %102 : vector<24x24xf32> to vector<24x24xbf16>
    %104 = vector.broadcast %87 : vector<1x32xf32> to vector<24x32xf32>
    %105 = arith.mulf %65, %104 : vector<24x32xf32>
    %106 = arith.truncf %105 : vector<24x32xf32> to vector<24x32xbf16>
    %cst_32 = arith.constant dense<0.000000e+00> : vector<24x32xf32>
    %107 = tpu.matmul %103, %106, %cst_32 {dimension_numbers = #tpu.dot_dimension_numbers<[1], [0], [0], [1], [0, 0, 1, 1], [], []>} : vector<24x24xbf16>, vector<24x32xbf16>, vector<24x32xf32> -> vector<24x32xf32>
    %108 = arith.addf %86, %107 : vector<24x32xf32>
    %109 = vector.extract_strided_slice %31 {offsets = [2, 0], sizes = [1, 32], strides = [1, 1]} : vector<4x32xf32> to vector<1x32xf32>
    %110 = vector.broadcast %109 : vector<1x32xf32> to vector<24x32xf32>
    %111 = arith.mulf %64, %110 : vector<24x32xf32>
    %112 = arith.truncf %111 : vector<24x32xf32> to vector<24x32xbf16>
    "tpu.trace_start"() <{level = 10 : i32, message = "qc,kc->qk"}> : () -> ()
    %cst_33 = arith.constant dense<0.000000e+00> : vector<24x24xf32>
    %113 = tpu.matmul %63, %112, %cst_33 {dimension_numbers = #tpu.dot_dimension_numbers<[1], [1], [0], [0], [0, 0, 1, 0], [], []>} : vector<24x32xbf16>, vector<24x32xbf16>, vector<24x24xf32> -> vector<24x24xf32>
    "tpu.trace_stop"() : () -> ()
    %114 = arith.addf %113, %30 : vector<24x24xf32>
    %cst_34 = arith.constant dense<0xFF800000> : vector<24xf32>
    %115 = vector.multi_reduction <maximumf>, %114, %cst_34 [1] : vector<24x24xf32> to vector<24xf32>
    %116 = vector.shape_cast %115 : vector<24xf32> to vector<24x1xf32>
    %117 = vector.broadcast %116 : vector<24x1xf32> to vector<24x24xf32>
    %118 = arith.subf %114, %117 : vector<24x24xf32>
    %119 = math.exp %118 : vector<24x24xf32>
    %cst_35 = arith.constant dense<0.000000e+00> : vector<24xf32>
    %120 = vector.multi_reduction <add>, %119, %cst_35 [1] : vector<24x24xf32> to vector<24xf32>
    %121 = vector.shape_cast %120 : vector<24xf32> to vector<24x1xf32>
    %122 = tpu.reciprocal %121 {approx = true} : vector<24x1xf32> -> vector<24x1xf32>
    %123 = vector.broadcast %122 : vector<24x1xf32> to vector<24x24xf32>
    %124 = arith.mulf %119, %123 : vector<24x24xf32>
    %125 = arith.truncf %124 : vector<24x24xf32> to vector<24x24xbf16>
    %126 = vector.broadcast %109 : vector<1x32xf32> to vector<24x32xf32>
    %127 = arith.mulf %65, %126 : vector<24x32xf32>
    %128 = arith.truncf %127 : vector<24x32xf32> to vector<24x32xbf16>
    %cst_36 = arith.constant dense<0.000000e+00> : vector<24x32xf32>
    %129 = tpu.matmul %125, %128, %cst_36 {dimension_numbers = #tpu.dot_dimension_numbers<[1], [0], [0], [1], [0, 0, 1, 1], [], []>} : vector<24x24xbf16>, vector<24x32xbf16>, vector<24x32xf32> -> vector<24x32xf32>
    %130 = arith.addf %108, %129 : vector<24x32xf32>
    %131 = vector.extract_strided_slice %31 {offsets = [3, 0], sizes = [1, 32], strides = [1, 1]} : vector<4x32xf32> to vector<1x32xf32>
    %132 = vector.broadcast %131 : vector<1x32xf32> to vector<24x32xf32>
    %133 = arith.mulf %64, %132 : vector<24x32xf32>
    %134 = arith.truncf %133 : vector<24x32xf32> to vector<24x32xbf16>
    "tpu.trace_start"() <{level = 10 : i32, message = "qc,kc->qk"}> : () -> ()
    %cst_37 = arith.constant dense<0.000000e+00> : vector<24x24xf32>
    %135 = tpu.matmul %63, %134, %cst_37 {dimension_numbers = #tpu.dot_dimension_numbers<[1], [1], [0], [0], [0, 0, 1, 0], [], []>} : vector<24x32xbf16>, vector<24x32xbf16>, vector<24x24xf32> -> vector<24x24xf32>
    "tpu.trace_stop"() : () -> ()
    %136 = arith.addf %135, %30 : vector<24x24xf32>
    %cst_38 = arith.constant dense<0xFF800000> : vector<24xf32>
    %137 = vector.multi_reduction <maximumf>, %136, %cst_38 [1] : vector<24x24xf32> to vector<24xf32>
    %138 = vector.shape_cast %137 : vector<24xf32> to vector<24x1xf32>
    %139 = vector.broadcast %138 : vector<24x1xf32> to vector<24x24xf32>
    %140 = arith.subf %136, %139 : vector<24x24xf32>
    %141 = math.exp %140 : vector<24x24xf32>
    %cst_39 = arith.constant dense<0.000000e+00> : vector<24xf32>
    %142 = vector.multi_reduction <add>, %141, %cst_39 [1] : vector<24x24xf32> to vector<24xf32>
    %143 = vector.shape_cast %142 : vector<24xf32> to vector<24x1xf32>
    %144 = tpu.reciprocal %143 {approx = true} : vector<24x1xf32> -> vector<24x1xf32>
    %145 = vector.broadcast %144 : vector<24x1xf32> to vector<24x24xf32>
    %146 = arith.mulf %141, %145 : vector<24x24xf32>
    %147 = arith.truncf %146 : vector<24x24xf32> to vector<24x24xbf16>
    %148 = vector.broadcast %131 : vector<1x32xf32> to vector<24x32xf32>
    %149 = arith.mulf %65, %148 : vector<24x32xf32>
    %150 = arith.truncf %149 : vector<24x32xf32> to vector<24x32xbf16>
    %cst_40 = arith.constant dense<0.000000e+00> : vector<24x32xf32>
    %151 = tpu.matmul %147, %150, %cst_40 {dimension_numbers = #tpu.dot_dimension_numbers<[1], [0], [0], [1], [0, 0, 1, 1], [], []>} : vector<24x24xbf16>, vector<24x32xbf16>, vector<24x32xf32> -> vector<24x32xf32>
    %152 = arith.addf %130, %151 : vector<24x32xf32>
    %153 = arith.truncf %152 : vector<24x32xf32> to vector<24x32xbf16>
    %c144 = arith.constant 144 : index
    %c0_41 = arith.constant 0 : index
    %154 = vector.load %arg2[%c144, %c0_41] : memref<368x128xbf16, #tpu.memory_space<vmem>>, vector<32x32xbf16>
    %cst_42 = arith.constant dense<0.000000e+00> : vector<24x32xf32>
    %155 = tpu.matmul %153, %154, %cst_42 {dimension_numbers = #tpu.dot_dimension_numbers<[1], [0], [0], [1], [0, 0, 1, 1], [], []>} : vector<24x32xbf16>, vector<32x32xbf16>, vector<24x32xf32> -> vector<24x32xf32>
    %156 = arith.addf %29, %155 : vector<24x32xf32>
    %c59 = arith.constant 59 : index
    %c0_43 = arith.constant 0 : index
    %157 = vector.load %arg3[%c59, %c0_43] : memref<72x128xf32, #tpu.memory_space<vmem>>, vector<1x32xf32>
    %158 = vector.broadcast %157 : vector<1x32xf32> to vector<24x32xf32>
    %159 = arith.addf %156, %158 : vector<24x32xf32>
    %c60 = arith.constant 60 : index
    %c0_44 = arith.constant 0 : index
    %160 = vector.load %arg3[%c60, %c0_44] : memref<72x128xf32, #tpu.memory_space<vmem>>, vector<1x32xf32>
    %c61 = arith.constant 61 : index
    %c0_45 = arith.constant 0 : index
    %161 = vector.load %arg3[%c61, %c0_45] : memref<72x128xf32, #tpu.memory_space<vmem>>, vector<1x32xf32>
    %cst_46 = arith.constant dense<0.000000e+00> : vector<24xf32>
    %162 = vector.multi_reduction <add>, %159, %cst_46 [1] : vector<24x32xf32> to vector<24xf32>
    %163 = vector.shape_cast %162 : vector<24xf32> to vector<24x1xf32>
    %cst_47 = arith.constant 3.200000e+01 : f32
    %164 = vector.broadcast %cst_47 : f32 to vector<24x1xf32>
    %165 = arith.divf %163, %164 : vector<24x1xf32>
    %166 = vector.broadcast %165 : vector<24x1xf32> to vector<24x32xf32>
    %167 = arith.subf %159, %166 : vector<24x32xf32>
    %168 = arith.mulf %167, %167 : vector<24x32xf32>
    %cst_48 = arith.constant dense<0.000000e+00> : vector<24xf32>
    %169 = vector.multi_reduction <add>, %168, %cst_48 [1] : vector<24x32xf32> to vector<24xf32>
    %170 = vector.shape_cast %169 : vector<24xf32> to vector<24x1xf32>
    %cst_49 = arith.constant 3.200000e+01 : f32
    %171 = vector.broadcast %cst_49 : f32 to vector<24x1xf32>
    %172 = arith.divf %170, %171 : vector<24x1xf32>
    %173 = vector.broadcast %165 : vector<24x1xf32> to vector<24x32xf32>
    %174 = arith.subf %159, %173 : vector<24x32xf32>
    %cst_50 = arith.constant 9.99999974E-6 : f32
    %175 = vector.broadcast %cst_50 : f32 to vector<24x1xf32>
    %176 = arith.addf %172, %175 : vector<24x1xf32>
    %177 = math.rsqrt %176 : vector<24x1xf32>
    %178 = vector.broadcast %177 : vector<24x1xf32> to vector<24x32xf32>
    %179 = arith.mulf %174, %178 : vector<24x32xf32>
    %180 = vector.broadcast %160 : vector<1x32xf32> to vector<24x32xf32>
    %181 = arith.mulf %179, %180 : vector<24x32xf32>
    %182 = vector.broadcast %161 : vector<1x32xf32> to vector<24x32xf32>
    %183 = arith.addf %181, %182 : vector<24x32xf32>
    %184 = arith.truncf %183 : vector<24x32xf32> to vector<24x32xbf16>
    %c176 = arith.constant 176 : index
    %c0_51 = arith.constant 0 : index
    %185 = vector.load %arg2[%c176, %c0_51] : memref<368x128xbf16, #tpu.memory_space<vmem>>, vector<32x128xbf16>
    %cst_52 = arith.constant dense<0.000000e+00> : vector<24x128xf32>
    %186 = tpu.matmul %184, %185, %cst_52 {dimension_numbers = #tpu.dot_dimension_numbers<[1], [0], [0], [1], [0, 0, 1, 1], [], []>} : vector<24x32xbf16>, vector<32x128xbf16>, vector<24x128xf32> -> vector<24x128xf32>
    %c62 = arith.constant 62 : index
    %c0_53 = arith.constant 0 : index
    %187 = vector.load %arg3[%c62, %c0_53] : memref<72x128xf32, #tpu.memory_space<vmem>>, vector<1x128xf32>
    %188 = vector.broadcast %187 : vector<1x128xf32> to vector<24x128xf32>
    %189 = arith.addf %186, %188 : vector<24x128xf32>
    %cst_54 = arith.constant 5.000000e-01 : f32
    %190 = vector.broadcast %cst_54 : f32 to vector<24x128xf32>
    %191 = arith.mulf %190, %189 : vector<24x128xf32>
    %192 = arith.mulf %189, %189 : vector<24x128xf32>
    %193 = arith.mulf %189, %192 : vector<24x128xf32>
    %cst_55 = arith.constant 4.471500e-02 : f32
    %194 = vector.broadcast %cst_55 : f32 to vector<24x128xf32>
    %195 = arith.mulf %194, %193 : vector<24x128xf32>
    %196 = arith.addf %189, %195 : vector<24x128xf32>
    %cst_56 = arith.constant 0.797884583 : f32
    %197 = vector.broadcast %cst_56 : f32 to vector<24x128xf32>
    %198 = arith.mulf %197, %196 : vector<24x128xf32>
    %199 = math.tanh %198 : vector<24x128xf32>
    %cst_57 = arith.constant 1.000000e+00 : f32
    %200 = vector.broadcast %cst_57 : f32 to vector<24x128xf32>
    %201 = arith.addf %200, %199 : vector<24x128xf32>
    %202 = arith.mulf %191, %201 : vector<24x128xf32>
    %203 = arith.truncf %202 : vector<24x128xf32> to vector<24x128xbf16>
    %c208 = arith.constant 208 : index
    %c0_58 = arith.constant 0 : index
    %204 = vector.load %arg2[%c208, %c0_58] : memref<368x128xbf16, #tpu.memory_space<vmem>>, vector<32x128xbf16>
    "tpu.trace_start"() <{level = 10 : i32, message = "qk,ck->qc"}> : () -> ()
    %cst_59 = arith.constant dense<0.000000e+00> : vector<24x32xf32>
    %205 = tpu.matmul %203, %204, %cst_59 {dimension_numbers = #tpu.dot_dimension_numbers<[1], [1], [0], [0], [0, 0, 1, 0], [], []>} : vector<24x128xbf16>, vector<32x128xbf16>, vector<24x32xf32> -> vector<24x32xf32>
    "tpu.trace_stop"() : () -> ()
    %206 = arith.addf %159, %205 : vector<24x32xf32>
    %c63 = arith.constant 63 : index
    %c0_60 = arith.constant 0 : index
    %207 = vector.load %arg3[%c63, %c0_60] : memref<72x128xf32, #tpu.memory_space<vmem>>, vector<1x32xf32>
    %208 = vector.broadcast %207 : vector<1x32xf32> to vector<24x32xf32>
    %209 = arith.addf %206, %208 : vector<24x32xf32>
    %c64 = arith.constant 64 : index
    %c0_61 = arith.constant 0 : index
    %210 = vector.load %arg3[%c64, %c0_61] : memref<72x128xf32, #tpu.memory_space<vmem>>, vector<1x32xf32>
    %c65 = arith.constant 65 : index
    %c0_62 = arith.constant 0 : index
    %211 = vector.load %arg3[%c65, %c0_62] : memref<72x128xf32, #tpu.memory_space<vmem>>, vector<1x32xf32>
    %cst_63 = arith.constant dense<0.000000e+00> : vector<24xf32>
    %212 = vector.multi_reduction <add>, %209, %cst_63 [1] : vector<24x32xf32> to vector<24xf32>
    %213 = vector.shape_cast %212 : vector<24xf32> to vector<24x1xf32>
    %cst_64 = arith.constant 3.200000e+01 : f32
    %214 = vector.broadcast %cst_64 : f32 to vector<24x1xf32>
    %215 = arith.divf %213, %214 : vector<24x1xf32>
    %216 = vector.broadcast %215 : vector<24x1xf32> to vector<24x32xf32>
    %217 = arith.subf %209, %216 : vector<24x32xf32>
    %218 = arith.mulf %217, %217 : vector<24x32xf32>
    %cst_65 = arith.constant dense<0.000000e+00> : vector<24xf32>
    %219 = vector.multi_reduction <add>, %218, %cst_65 [1] : vector<24x32xf32> to vector<24xf32>
    %220 = vector.shape_cast %219 : vector<24xf32> to vector<24x1xf32>
    %cst_66 = arith.constant 3.200000e+01 : f32
    %221 = vector.broadcast %cst_66 : f32 to vector<24x1xf32>
    %222 = arith.divf %220, %221 : vector<24x1xf32>
    %223 = vector.broadcast %215 : vector<24x1xf32> to vector<24x32xf32>
    %224 = arith.subf %209, %223 : vector<24x32xf32>
    %cst_67 = arith.constant 9.99999974E-6 : f32
    %225 = vector.broadcast %cst_67 : f32 to vector<24x1xf32>
    %226 = arith.addf %222, %225 : vector<24x1xf32>
    %227 = math.rsqrt %226 : vector<24x1xf32>
    %228 = vector.broadcast %227 : vector<24x1xf32> to vector<24x32xf32>
    %229 = arith.mulf %224, %228 : vector<24x32xf32>
    %230 = vector.broadcast %210 : vector<1x32xf32> to vector<24x32xf32>
    %231 = arith.mulf %229, %230 : vector<24x32xf32>
    %232 = vector.broadcast %211 : vector<1x32xf32> to vector<24x32xf32>
    %233 = arith.addf %231, %232 : vector<24x32xf32>
    %234 = arith.truncf %233 : vector<24x32xf32> to vector<24x32xbf16>
    %c240 = arith.constant 240 : index
    %c0_68 = arith.constant 0 : index
    %235 = vector.load %arg2[%c240, %c0_68] : memref<368x128xbf16, #tpu.memory_space<vmem>>, vector<32x96xbf16>
    %cst_69 = arith.constant dense<0.000000e+00> : vector<24x96xf32>
    %236 = tpu.matmul %234, %235, %cst_69 {dimension_numbers = #tpu.dot_dimension_numbers<[1], [0], [0], [1], [0, 0, 1, 1], [], []>} : vector<24x32xbf16>, vector<32x96xbf16>, vector<24x96xf32> -> vector<24x96xf32>
    %c66 = arith.constant 66 : index
    %c0_70 = arith.constant 0 : index
    %237 = vector.load %arg3[%c66, %c0_70] : memref<72x128xf32, #tpu.memory_space<vmem>>, vector<1x96xf32>
    %238 = vector.broadcast %237 : vector<1x96xf32> to vector<24x96xf32>
    %239 = arith.addf %236, %238 : vector<24x96xf32>
    %240 = vector.extract_strided_slice %239 {offsets = [0, 0], sizes = [24, 32], strides = [1, 1]} : vector<24x96xf32> to vector<24x32xf32>
    %241 = arith.truncf %240 : vector<24x32xf32> to vector<24x32xbf16>
    %242 = vector.extract_strided_slice %239 {offsets = [0, 32], sizes = [24, 32], strides = [1, 1]} : vector<24x96xf32> to vector<24x32xf32>
    %243 = vector.extract_strided_slice %239 {offsets = [0, 64], sizes = [24, 32], strides = [1, 1]} : vector<24x96xf32> to vector<24x32xf32>
    %244 = vector.extract_strided_slice %31 {offsets = [0, 0], sizes = [1, 32], strides = [1, 1]} : vector<4x32xf32> to vector<1x32xf32>
    %245 = vector.broadcast %244 : vector<1x32xf32> to vector<24x32xf32>
    %246 = arith.mulf %242, %245 : vector<24x32xf32>
    %247 = arith.truncf %246 : vector<24x32xf32> to vector<24x32xbf16>
    "tpu.trace_start"() <{level = 10 : i32, message = "qc,kc->qk"}> : () -> ()
    %cst_71 = arith.constant dense<0.000000e+00> : vector<24x24xf32>
    %248 = tpu.matmul %241, %247, %cst_71 {dimension_numbers = #tpu.dot_dimension_numbers<[1], [1], [0], [0], [0, 0, 1, 0], [], []>} : vector<24x32xbf16>, vector<24x32xbf16>, vector<24x24xf32> -> vector<24x24xf32>
    "tpu.trace_stop"() : () -> ()
    %249 = arith.addf %248, %30 : vector<24x24xf32>
    %cst_72 = arith.constant dense<0xFF800000> : vector<24xf32>
    %250 = vector.multi_reduction <maximumf>, %249, %cst_72 [1] : vector<24x24xf32> to vector<24xf32>
    %251 = vector.shape_cast %250 : vector<24xf32> to vector<24x1xf32>
    %252 = vector.broadcast %251 : vector<24x1xf32> to vector<24x24xf32>
    %253 = arith.subf %249, %252 : vector<24x24xf32>
    %254 = math.exp %253 : vector<24x24xf32>
    %cst_73 = arith.constant dense<0.000000e+00> : vector<24xf32>
    %255 = vector.multi_reduction <add>, %254, %cst_73 [1] : vector<24x24xf32> to vector<24xf32>
    %256 = vector.shape_cast %255 : vector<24xf32> to vector<24x1xf32>
    %257 = tpu.reciprocal %256 {approx = true} : vector<24x1xf32> -> vector<24x1xf32>
    %258 = vector.broadcast %257 : vector<24x1xf32> to vector<24x24xf32>
    %259 = arith.mulf %254, %258 : vector<24x24xf32>
    %260 = arith.truncf %259 : vector<24x24xf32> to vector<24x24xbf16>
    %261 = vector.broadcast %244 : vector<1x32xf32> to vector<24x32xf32>
    %262 = arith.mulf %243, %261 : vector<24x32xf32>
    %263 = arith.truncf %262 : vector<24x32xf32> to vector<24x32xbf16>
    %cst_74 = arith.constant dense<0.000000e+00> : vector<24x32xf32>
    %264 = tpu.matmul %260, %263, %cst_74 {dimension_numbers = #tpu.dot_dimension_numbers<[1], [0], [0], [1], [0, 0, 1, 1], [], []>} : vector<24x24xbf16>, vector<24x32xbf16>, vector<24x32xf32> -> vector<24x32xf32>
    %265 = vector.extract_strided_slice %31 {offsets = [1, 0], sizes = [1, 32], strides = [1, 1]} : vector<4x32xf32> to vector<1x32xf32>
    %266 = vector.broadcast %265 : vector<1x32xf32> to vector<24x32xf32>
    %267 = arith.mulf %242, %266 : vector<24x32xf32>
    %268 = arith.truncf %267 : vector<24x32xf32> to vector<24x32xbf16>
    "tpu.trace_start"() <{level = 10 : i32, message = "qc,kc->qk"}> : () -> ()
    %cst_75 = arith.constant dense<0.000000e+00> : vector<24x24xf32>
    %269 = tpu.matmul %241, %268, %cst_75 {dimension_numbers = #tpu.dot_dimension_numbers<[1], [1], [0], [0], [0, 0, 1, 0], [], []>} : vector<24x32xbf16>, vector<24x32xbf16>, vector<24x24xf32> -> vector<24x24xf32>
    "tpu.trace_stop"() : () -> ()
    %270 = arith.addf %269, %30 : vector<24x24xf32>
    %cst_76 = arith.constant dense<0xFF800000> : vector<24xf32>
    %271 = vector.multi_reduction <maximumf>, %270, %cst_76 [1] : vector<24x24xf32> to vector<24xf32>
    %272 = vector.shape_cast %271 : vector<24xf32> to vector<24x1xf32>
    %273 = vector.broadcast %272 : vector<24x1xf32> to vector<24x24xf32>
    %274 = arith.subf %270, %273 : vector<24x24xf32>
    %275 = math.exp %274 : vector<24x24xf32>
    %cst_77 = arith.constant dense<0.000000e+00> : vector<24xf32>
    %276 = vector.multi_reduction <add>, %275, %cst_77 [1] : vector<24x24xf32> to vector<24xf32>
    %277 = vector.shape_cast %276 : vector<24xf32> to vector<24x1xf32>
    %278 = tpu.reciprocal %277 {approx = true} : vector<24x1xf32> -> vector<24x1xf32>
    %279 = vector.broadcast %278 : vector<24x1xf32> to vector<24x24xf32>
    %280 = arith.mulf %275, %279 : vector<24x24xf32>
    %281 = arith.truncf %280 : vector<24x24xf32> to vector<24x24xbf16>
    %282 = vector.broadcast %265 : vector<1x32xf32> to vector<24x32xf32>
    %283 = arith.mulf %243, %282 : vector<24x32xf32>
    %284 = arith.truncf %283 : vector<24x32xf32> to vector<24x32xbf16>
    %cst_78 = arith.constant dense<0.000000e+00> : vector<24x32xf32>
    %285 = tpu.matmul %281, %284, %cst_78 {dimension_numbers = #tpu.dot_dimension_numbers<[1], [0], [0], [1], [0, 0, 1, 1], [], []>} : vector<24x24xbf16>, vector<24x32xbf16>, vector<24x32xf32> -> vector<24x32xf32>
    %286 = arith.addf %264, %285 : vector<24x32xf32>
    %287 = vector.extract_strided_slice %31 {offsets = [2, 0], sizes = [1, 32], strides = [1, 1]} : vector<4x32xf32> to vector<1x32xf32>
    %288 = vector.broadcast %287 : vector<1x32xf32> to vector<24x32xf32>
    %289 = arith.mulf %242, %288 : vector<24x32xf32>
    %290 = arith.truncf %289 : vector<24x32xf32> to vector<24x32xbf16>
    "tpu.trace_start"() <{level = 10 : i32, message = "qc,kc->qk"}> : () -> ()
    %cst_79 = arith.constant dense<0.000000e+00> : vector<24x24xf32>
    %291 = tpu.matmul %241, %290, %cst_79 {dimension_numbers = #tpu.dot_dimension_numbers<[1], [1], [0], [0], [0, 0, 1, 0], [], []>} : vector<24x32xbf16>, vector<24x32xbf16>, vector<24x24xf32> -> vector<24x24xf32>
    "tpu.trace_stop"() : () -> ()
    %292 = arith.addf %291, %30 : vector<24x24xf32>
    %cst_80 = arith.constant dense<0xFF800000> : vector<24xf32>
    %293 = vector.multi_reduction <maximumf>, %292, %cst_80 [1] : vector<24x24xf32> to vector<24xf32>
    %294 = vector.shape_cast %293 : vector<24xf32> to vector<24x1xf32>
    %295 = vector.broadcast %294 : vector<24x1xf32> to vector<24x24xf32>
    %296 = arith.subf %292, %295 : vector<24x24xf32>
    %297 = math.exp %296 : vector<24x24xf32>
    %cst_81 = arith.constant dense<0.000000e+00> : vector<24xf32>
    %298 = vector.multi_reduction <add>, %297, %cst_81 [1] : vector<24x24xf32> to vector<24xf32>
    %299 = vector.shape_cast %298 : vector<24xf32> to vector<24x1xf32>
    %300 = tpu.reciprocal %299 {approx = true} : vector<24x1xf32> -> vector<24x1xf32>
    %301 = vector.broadcast %300 : vector<24x1xf32> to vector<24x24xf32>
    %302 = arith.mulf %297, %301 : vector<24x24xf32>
    %303 = arith.truncf %302 : vector<24x24xf32> to vector<24x24xbf16>
    %304 = vector.broadcast %287 : vector<1x32xf32> to vector<24x32xf32>
    %305 = arith.mulf %243, %304 : vector<24x32xf32>
    %306 = arith.truncf %305 : vector<24x32xf32> to vector<24x32xbf16>
    %cst_82 = arith.constant dense<0.000000e+00> : vector<24x32xf32>
    %307 = tpu.matmul %303, %306, %cst_82 {dimension_numbers = #tpu.dot_dimension_numbers<[1], [0], [0], [1], [0, 0, 1, 1], [], []>} : vector<24x24xbf16>, vector<24x32xbf16>, vector<24x32xf32> -> vector<24x32xf32>
    %308 = arith.addf %286, %307 : vector<24x32xf32>
    %309 = vector.extract_strided_slice %31 {offsets = [3, 0], sizes = [1, 32], strides = [1, 1]} : vector<4x32xf32> to vector<1x32xf32>
    %310 = vector.broadcast %309 : vector<1x32xf32> to vector<24x32xf32>
    %311 = arith.mulf %242, %310 : vector<24x32xf32>
    %312 = arith.truncf %311 : vector<24x32xf32> to vector<24x32xbf16>
    "tpu.trace_start"() <{level = 10 : i32, message = "qc,kc->qk"}> : () -> ()
    %cst_83 = arith.constant dense<0.000000e+00> : vector<24x24xf32>
    %313 = tpu.matmul %241, %312, %cst_83 {dimension_numbers = #tpu.dot_dimension_numbers<[1], [1], [0], [0], [0, 0, 1, 0], [], []>} : vector<24x32xbf16>, vector<24x32xbf16>, vector<24x24xf32> -> vector<24x24xf32>
    "tpu.trace_stop"() : () -> ()
    %314 = arith.addf %313, %30 : vector<24x24xf32>
    %cst_84 = arith.constant dense<0xFF800000> : vector<24xf32>
    %315 = vector.multi_reduction <maximumf>, %314, %cst_84 [1] : vector<24x24xf32> to vector<24xf32>
    %316 = vector.shape_cast %315 : vector<24xf32> to vector<24x1xf32>
    %317 = vector.broadcast %316 : vector<24x1xf32> to vector<24x24xf32>
    %318 = arith.subf %314, %317 : vector<24x24xf32>
    %319 = math.exp %318 : vector<24x24xf32>
    %cst_85 = arith.constant dense<0.000000e+00> : vector<24xf32>
    %320 = vector.multi_reduction <add>, %319, %cst_85 [1] : vector<24x24xf32> to vector<24xf32>
    %321 = vector.shape_cast %320 : vector<24xf32> to vector<24x1xf32>
    %322 = tpu.reciprocal %321 {approx = true} : vector<24x1xf32> -> vector<24x1xf32>
    %323 = vector.broadcast %322 : vector<24x1xf32> to vector<24x24xf32>
    %324 = arith.mulf %319, %323 : vector<24x24xf32>
    %325 = arith.truncf %324 : vector<24x24xf32> to vector<24x24xbf16>
    %326 = vector.broadcast %309 : vector<1x32xf32> to vector<24x32xf32>
    %327 = arith.mulf %243, %326 : vector<24x32xf32>
    %328 = arith.truncf %327 : vector<24x32xf32> to vector<24x32xbf16>
    %cst_86 = arith.constant dense<0.000000e+00> : vector<24x32xf32>
    %329 = tpu.matmul %325, %328, %cst_86 {dimension_numbers = #tpu.dot_dimension_numbers<[1], [0], [0], [1], [0, 0, 1, 1], [], []>} : vector<24x24xbf16>, vector<24x32xbf16>, vector<24x32xf32> -> vector<24x32xf32>
    %330 = arith.addf %308, %329 : vector<24x32xf32>
    %331 = arith.truncf %330 : vector<24x32xf32> to vector<24x32xbf16>
    %c272 = arith.constant 272 : index
    %c0_87 = arith.constant 0 : index
    %332 = vector.load %arg2[%c272, %c0_87] : memref<368x128xbf16, #tpu.memory_space<vmem>>, vector<32x32xbf16>
    %cst_88 = arith.constant dense<0.000000e+00> : vector<24x32xf32>
    %333 = tpu.matmul %331, %332, %cst_88 {dimension_numbers = #tpu.dot_dimension_numbers<[1], [0], [0], [1], [0, 0, 1, 1], [], []>} : vector<24x32xbf16>, vector<32x32xbf16>, vector<24x32xf32> -> vector<24x32xf32>
    %334 = arith.addf %209, %333 : vector<24x32xf32>
    %c67 = arith.constant 67 : index
    %c0_89 = arith.constant 0 : index
    %335 = vector.load %arg3[%c67, %c0_89] : memref<72x128xf32, #tpu.memory_space<vmem>>, vector<1x32xf32>
    %336 = vector.broadcast %335 : vector<1x32xf32> to vector<24x32xf32>
    %337 = arith.addf %334, %336 : vector<24x32xf32>
    %c68 = arith.constant 68 : index
    %c0_90 = arith.constant 0 : index
    %338 = vector.load %arg3[%c68, %c0_90] : memref<72x128xf32, #tpu.memory_space<vmem>>, vector<1x32xf32>
    %c69 = arith.constant 69 : index
    %c0_91 = arith.constant 0 : index
    %339 = vector.load %arg3[%c69, %c0_91] : memref<72x128xf32, #tpu.memory_space<vmem>>, vector<1x32xf32>
    %cst_92 = arith.constant dense<0.000000e+00> : vector<24xf32>
    %340 = vector.multi_reduction <add>, %337, %cst_92 [1] : vector<24x32xf32> to vector<24xf32>
    %341 = vector.shape_cast %340 : vector<24xf32> to vector<24x1xf32>
    %cst_93 = arith.constant 3.200000e+01 : f32
    %342 = vector.broadcast %cst_93 : f32 to vector<24x1xf32>
    %343 = arith.divf %341, %342 : vector<24x1xf32>
    %344 = vector.broadcast %343 : vector<24x1xf32> to vector<24x32xf32>
    %345 = arith.subf %337, %344 : vector<24x32xf32>
    %346 = arith.mulf %345, %345 : vector<24x32xf32>
    %cst_94 = arith.constant dense<0.000000e+00> : vector<24xf32>
    %347 = vector.multi_reduction <add>, %346, %cst_94 [1] : vector<24x32xf32> to vector<24xf32>
    %348 = vector.shape_cast %347 : vector<24xf32> to vector<24x1xf32>
    %cst_95 = arith.constant 3.200000e+01 : f32
    %349 = vector.broadcast %cst_95 : f32 to vector<24x1xf32>
    %350 = arith.divf %348, %349 : vector<24x1xf32>
    %351 = vector.broadcast %343 : vector<24x1xf32> to vector<24x32xf32>
    %352 = arith.subf %337, %351 : vector<24x32xf32>
    %cst_96 = arith.constant 9.99999974E-6 : f32
    %353 = vector.broadcast %cst_96 : f32 to vector<24x1xf32>
    %354 = arith.addf %350, %353 : vector<24x1xf32>
    %355 = math.rsqrt %354 : vector<24x1xf32>
    %356 = vector.broadcast %355 : vector<24x1xf32> to vector<24x32xf32>
    %357 = arith.mulf %352, %356 : vector<24x32xf32>
    %358 = vector.broadcast %338 : vector<1x32xf32> to vector<24x32xf32>
    %359 = arith.mulf %357, %358 : vector<24x32xf32>
    %360 = vector.broadcast %339 : vector<1x32xf32> to vector<24x32xf32>
    %361 = arith.addf %359, %360 : vector<24x32xf32>
    %362 = arith.truncf %361 : vector<24x32xf32> to vector<24x32xbf16>
    %c304 = arith.constant 304 : index
    %c0_97 = arith.constant 0 : index
    %363 = vector.load %arg2[%c304, %c0_97] : memref<368x128xbf16, #tpu.memory_space<vmem>>, vector<32x128xbf16>
    %cst_98 = arith.constant dense<0.000000e+00> : vector<24x128xf32>
    %364 = tpu.matmul %362, %363, %cst_98 {dimension_numbers = #tpu.dot_dimension_numbers<[1], [0], [0], [1], [0, 0, 1, 1], [], []>} : vector<24x32xbf16>, vector<32x128xbf16>, vector<24x128xf32> -> vector<24x128xf32>
    %c70 = arith.constant 70 : index
    %c0_99 = arith.constant 0 : index
    %365 = vector.load %arg3[%c70, %c0_99] : memref<72x128xf32, #tpu.memory_space<vmem>>, vector<1x128xf32>
    %366 = vector.broadcast %365 : vector<1x128xf32> to vector<24x128xf32>
    %367 = arith.addf %364, %366 : vector<24x128xf32>
    %cst_100 = arith.constant 5.000000e-01 : f32
    %368 = vector.broadcast %cst_100 : f32 to vector<24x128xf32>
    %369 = arith.mulf %368, %367 : vector<24x128xf32>
    %370 = arith.mulf %367, %367 : vector<24x128xf32>
    %371 = arith.mulf %367, %370 : vector<24x128xf32>
    %cst_101 = arith.constant 4.471500e-02 : f32
    %372 = vector.broadcast %cst_101 : f32 to vector<24x128xf32>
    %373 = arith.mulf %372, %371 : vector<24x128xf32>
    %374 = arith.addf %367, %373 : vector<24x128xf32>
    %cst_102 = arith.constant 0.797884583 : f32
    %375 = vector.broadcast %cst_102 : f32 to vector<24x128xf32>
    %376 = arith.mulf %375, %374 : vector<24x128xf32>
    %377 = math.tanh %376 : vector<24x128xf32>
    %cst_103 = arith.constant 1.000000e+00 : f32
    %378 = vector.broadcast %cst_103 : f32 to vector<24x128xf32>
    %379 = arith.addf %378, %377 : vector<24x128xf32>
    %380 = arith.mulf %369, %379 : vector<24x128xf32>
    %381 = arith.truncf %380 : vector<24x128xf32> to vector<24x128xbf16>
    %c336 = arith.constant 336 : index
    %c0_104 = arith.constant 0 : index
    %382 = vector.load %arg2[%c336, %c0_104] : memref<368x128xbf16, #tpu.memory_space<vmem>>, vector<32x128xbf16>
    "tpu.trace_start"() <{level = 10 : i32, message = "qk,ck->qc"}> : () -> ()
    %cst_105 = arith.constant dense<0.000000e+00> : vector<24x32xf32>
    %383 = tpu.matmul %381, %382, %cst_105 {dimension_numbers = #tpu.dot_dimension_numbers<[1], [1], [0], [0], [0, 0, 1, 0], [], []>} : vector<24x128xbf16>, vector<32x128xbf16>, vector<24x32xf32> -> vector<24x32xf32>
    "tpu.trace_stop"() : () -> ()
    %384 = arith.addf %337, %383 : vector<24x32xf32>
    %c71 = arith.constant 71 : index
    %c0_106 = arith.constant 0 : index
    %385 = vector.load %arg3[%c71, %c0_106] : memref<72x128xf32, #tpu.memory_space<vmem>>, vector<1x32xf32>
    %386 = vector.broadcast %385 : vector<1x32xf32> to vector<24x32xf32>
    %387 = arith.addf %384, %386 : vector<24x32xf32>
    %c54 = arith.constant 54 : index
    %c0_107 = arith.constant 0 : index
    %388 = vector.load %arg3[%c54, %c0_107] : memref<72x128xf32, #tpu.memory_space<vmem>>, vector<1x32xf32>
    %c55 = arith.constant 55 : index
    %c0_108 = arith.constant 0 : index
    %389 = vector.load %arg3[%c55, %c0_108] : memref<72x128xf32, #tpu.memory_space<vmem>>, vector<1x32xf32>
    %cst_109 = arith.constant dense<0.000000e+00> : vector<24xf32>
    %390 = vector.multi_reduction <add>, %387, %cst_109 [1] : vector<24x32xf32> to vector<24xf32>
    %391 = vector.shape_cast %390 : vector<24xf32> to vector<24x1xf32>
    %cst_110 = arith.constant 3.200000e+01 : f32
    %392 = vector.broadcast %cst_110 : f32 to vector<24x1xf32>
    %393 = arith.divf %391, %392 : vector<24x1xf32>
    %394 = vector.broadcast %393 : vector<24x1xf32> to vector<24x32xf32>
    %395 = arith.subf %387, %394 : vector<24x32xf32>
    %396 = arith.mulf %395, %395 : vector<24x32xf32>
    %cst_111 = arith.constant dense<0.000000e+00> : vector<24xf32>
    %397 = vector.multi_reduction <add>, %396, %cst_111 [1] : vector<24x32xf32> to vector<24xf32>
    %398 = vector.shape_cast %397 : vector<24xf32> to vector<24x1xf32>
    %cst_112 = arith.constant 3.200000e+01 : f32
    %399 = vector.broadcast %cst_112 : f32 to vector<24x1xf32>
    %400 = arith.divf %398, %399 : vector<24x1xf32>
    %401 = vector.broadcast %393 : vector<24x1xf32> to vector<24x32xf32>
    %402 = arith.subf %387, %401 : vector<24x32xf32>
    %cst_113 = arith.constant 9.99999974E-6 : f32
    %403 = vector.broadcast %cst_113 : f32 to vector<24x1xf32>
    %404 = arith.addf %400, %403 : vector<24x1xf32>
    %405 = math.rsqrt %404 : vector<24x1xf32>
    %406 = vector.broadcast %405 : vector<24x1xf32> to vector<24x32xf32>
    %407 = arith.mulf %402, %406 : vector<24x32xf32>
    %408 = vector.broadcast %388 : vector<1x32xf32> to vector<24x32xf32>
    %409 = arith.mulf %407, %408 : vector<24x32xf32>
    %410 = vector.broadcast %389 : vector<1x32xf32> to vector<24x32xf32>
    %411 = arith.addf %409, %410 : vector<24x32xf32>
    %412 = arith.truncf %411 : vector<24x32xf32> to vector<24x32xbf16>
    %c80_114 = arith.constant 80 : index
    %c0_115 = arith.constant 0 : index
    %413 = vector.load %arg2[%c80_114, %c0_115] : memref<368x128xbf16, #tpu.memory_space<vmem>>, vector<32x128xbf16>
    %cst_116 = arith.constant dense<0.000000e+00> : vector<24x128xf32>
    %414 = tpu.matmul %412, %413, %cst_116 {dimension_numbers = #tpu.dot_dimension_numbers<[1], [0], [0], [1], [0, 0, 1, 1], [], []>} : vector<24x32xbf16>, vector<32x128xbf16>, vector<24x128xf32> -> vector<24x128xf32>
    %c0_117 = arith.constant 0 : index
    %c0_118 = arith.constant 0 : index
    %415 = vector.load %arg4[%c0_117, %c0_118] : memref<24x128xf32, #tpu.memory_space<vmem>>, vector<24x128xf32>
    tpu.vector_store %arg4[%c0_117, %c0_118], %414 {strides = array<i32>} : memref<24x128xf32, #tpu.memory_space<vmem>>, vector<24x128xf32>,
    return
  }
}

</mosaic_0001>

<bundles_post_ra>
// kernel: tpu_custom_call.1
= control target key start
LH: loop header
LB: loop body
LE: loop exit
PB: predicated region body
PF: predicated region fallthrough
CT: control target
= control target key end

     0   :  { %9 = vsyncpa [#allocation3], 0  ;;  %s4225_s0 = inlined_call_operand.vmem [shape: s32[16,1], index: 0, kind: input, shape index: {}]   ;;  %s4226_s1 = inlined_call_operand.vmem [shape: f32[2,16], index: 1, kind: input, shape index: {}]   ;;  %s4227_s2 = inlined_call_operand.hbm [shape: bf16[368,128], index: 2, kind: input, shape index: {}]   ;;  %s4228_s3 = inlined_call_operand.hbm [shape: f32[72,128], index: 3, kind: input, shape index: {}]   ;;  %s4229_s4 = inlined_call_operand.hbm [shape: f32[24,128], index: 4, kind: output, shape index: {}]  }
   0x1   :  { %10 = vsyncpa [#allocation6], 0 }
   0x2   :  { %11 = vsyncpa [#allocation4], 0  ;;  %s3504_s15 = smov [#allocation2]   ;;  %s3432_s19 = scalar_lea.hbm %s4227_s2, 2944 }
   0x3   :  { %s21_s16 = sshll.u32 %s3504_s15, 4  ;;  %p3433_p0 = scmp.ne.s32.totalorder %s4227_s2, %s3432_s19  ;;  %s22_s16 = int_to_ptr.vmem [resolvable:$true] %s21_s16 }
   0x4   :  { %p3436_p1 = scmp.lt.u32.totalorder %s3432_s19, %s4227_s2 }
   0x6   :  { %p3438_p2 = pnand %p3436_p1, %p3433_p0 }
   0x8   :  { %3441 = shalt.err (!%p3438_p2)
}
   0x9   :  { %s3442_s24 = scalar_lea.vmem %s22_s16, 2944  ;;  %p3447_p4 = scmp.lt.s32.totalorder %s22_s16, %s22_s16 }
   0xa   :  { %p3443_p3 = scmp.ne.s32.totalorder %s22_s16, %s3442_s24  ;;  %p3448_p5 = scmp.lt.s32.totalorder %s3442_s24, %s3442_s24 }
   0xc   :  { %p3449_p6 = por %p3448_p5, %p3447_p4 }
   0xe   :  { %p3450_p7 = pnand %p3449_p6, %p3443_p3 }
  0x10   :  { %3453 = shalt.err (!%p3450_p7)
}
  0x11   :  { %s3505_s25 = smov 64   ;;  %s3506_s26 = smov 4  }
  0x12   :  { %27 = dma.hbm_to_vmem [thread:$0]  %s4227_s2, 2944, %s22_s16, [#allocation3], %s3505_s25, %s3505_s25, %s3506_s26  }
  0x13   :  { %s3507_s29 = smov [#allocation5]   ;;  %s3454_s7 = scalar_lea.hbm %s4228_s3, 1152 }
  0x14   :  { %s33_s30 = sshll.u32 %s3507_s29, 4  ;;  %p3455_p8 = scmp.ne.s32.totalorder %s4228_s3, %s3454_s7  ;;  %s34_s30 = int_to_ptr.vmem [resolvable:$true] %s33_s30 }
  0x15   :  { %p3458_p9 = scmp.lt.u32.totalorder %s3454_s7, %s4228_s3 }
  0x17   :  { %p3460_p10 = pnand %p3458_p9, %p3455_p8 }
  0x19   :  { %3463 = shalt.err (!%p3460_p10)
}
  0x1a   :  { %s3464_s12 = scalar_lea.vmem %s34_s30, 1152  ;;  %p3469_p12 = scmp.lt.s32.totalorder %s34_s30, %s34_s30 }
  0x1b   :  { %p3465_p11 = scmp.ne.s32.totalorder %s34_s30, %s3464_s12  ;;  %p3470_p13 = scmp.lt.s32.totalorder %s3464_s12, %s3464_s12 }
  0x1d   :  { %p3471_p0 = por %p3470_p13, %p3469_p12 }
  0x1f   :  { %p3472_p1 = pnand %p3471_p0, %p3465_p11 }
  0x21   :  { %3475 = shalt.err (!%p3472_p1)
}
  0x22   :  { %s3508_s2 = smov 128   ;;  %s3509_s13 = smov 8  }
  0x23   :  { %39 = dma.hbm_to_vmem [thread:$0]  %s4228_s3, 1152, %s34_s30, [#allocation6], %s3508_s2, %s3508_s2, %s3509_s13  }
  0x24   :  { %3498 = dma.done.wait [#allocation3], 2944  }
  0x25   :  { %3499 = vsyncadd [#allocation3], 4294964352 }
  0x26   :  { %3500 = dma.done.wait [#allocation6], 1152  }
  0x27   :  { %3501 = vsyncadd [#allocation6], 4294966144  ;;  %v3510_v0 = vmov 0.0   ;;  %vm3511_vm0 = vmmov 0   ;;  %v3512_v1 = vmov 0   ;;  %v3264_v2 = vld [vmem:[#allocation2] sm:$0xff]   ;;  %v49_v13 = vlaneseq }
  0x28   :  { %2984 = vmatprep.subr.bf16.mxu1 %v3510_v0  ;;  %2986 = vmatprep.mubr.msk.bf16.mxu1 %vm3511_vm0, %v3510_v0  ;;  %v121_v3 = vld [vmem:[%s4226_s1] sm:$0x3]  ;;  %vm136_vm1 = vcmask 130048   ;;  %v48_v6 = vld [vmem:[%s4225_s0 + $0x8] sm:$0xff]  ;;  %v3267_v9 = vld [vmem:[#allocation2 + $0x18] sm:$0xff]   ;;  %vm219_vm5 = vcmask 523264  }
  0x29   :  { %3263 = vset.pattern.permute.xlu0 %v3512_v1  ;;  %2976 = vmatprep.subr.bf16.mxu0 %v3510_v0  ;;  %v47_v4 = vld [vmem:[%s4225_s0] sm:$0xff]  ;;  %v122_v5 = vpack.c.bf16 %v121_v3, %v121_v3  ;;  %v3266_v8 = vld [vmem:[#allocation2 + $0x10] sm:$0xff]   ;;  %v3268_v10 = vld [vmem:[#allocation2 + $0x20] sm:$0xff]   ;;  %v50_v14 = vand.u32 127, %v49_v13  ;;  %v3513_v17 = vmov 1.0|1.0  }
  0x2a   :  { %2980 = vmatprep.mubr.msk.bf16.mxu0 %vm3511_vm0, %v3510_v0  ;;  %2985 = vmatpush3.bf16.msra.mxu1 %v3264_v2  ;;  %v3265_v7 = vld [vmem:[#allocation2 + $0x8] sm:$0xff]   ;;  %v3270_v12 = vld [vmem:[#allocation2 + $0x30] sm:$0xff]   ;;  %s3514_s0 = smov 96   ;;  %s3515_s1 = smov 32   ;;  %v283_v39 = vld [vmem:[#allocation5 + $0x20] sm:$0xff]  ;;  %vm294_vm6 = vcmask 261120  }
  0x2b   :  { %52 = vperm.xlu0 %3263, %v47_v4   ;;  %2990 = vmatprep.subr.bf16.mxu1 %v3510_v0  ;;  %v3269_v11 = vld [vmem:[#allocation2 + $0x28] sm:$0xff]   ;;  %v284_v41 = vld [vmem:[#allocation5 + $0x28] sm:$0xff]  ;;  %vm276_vm7 = vcmask 1041408   ;;  %vm278_vm8 = vcmask 1043456   ;;  %vm280_vm9 = vcmask 1045504   ;;  %v282_v48 = vld [vmem:[#allocation5 + $0x18] sm:$0xff] }
  0x2c   :  { %2977 = vmatpush3.bf16.xpose.msra.mxu0 %v3269_v11  ;;  %v2775_v18 = vld [vmem:[#allocation5 + $0x34] ss:$0 sm:$0xff]  ;;  %v2778_v30 = vld [vmem:[#allocation5 + $0x35] ss:$0 sm:$0xff]  ;;  %vm507_vm10 = vcmask 195584   ;;  %s3516_s21 = smov [#allocation7]  }
  0x2d   :  { %2987 = vmatmul.mubr.msk.bf16.vlgmr.msra.gmra.mrb[0].mxu1 %vm136_vm1, %v122_v5  ;;  %2978 = vmatprep.subr.bf16.mxu0 %v3510_v0  ;;  %v3271_v5 = vld [vmem:[#allocation2 + $0x38] sm:$0xff]   ;;  %s2756_s22 = sshll.u32 %s3516_s21, 4  ;;  %s2757_s22 = int_to_ptr.vmem [resolvable:$true] %s2756_s22 }
  0x2e   :  { %2998 = vmatprep.mubr.msk.bf16.mxu1 %vm3511_vm0, %v3510_v0  ;;  %2991 = vmatpush3.bf16.msra.mxu1 %v3265_v7  ;;  %v429_v7 = vshrl.u32 %v49_v13, 7  ;;  %s3476_s23 = scalar_lea.vmem %s2757_s22, 384  ;;  %p3481_p3 = scmp.lt.s32.totalorder %s2757_s22, %s2757_s22 }
  0x2f   :  { %55 = vperm.xlu0 %3263, %v48_v6   ;;  %2992 = vmatprep.subr.bf16.mxu1 %v3510_v0  ;;  %v3272_v6 = vld [vmem:[#allocation2 + $0x40] sm:$0xff]   ;;  %p3477_p2 = scmp.ne.s32.totalorder %s2757_s22, %s3476_s23  ;;  %p3482_p4 = scmp.lt.s32.totalorder %s3476_s23, %s3476_s23 }
  0x30   :  { %v980_v11 = vsub.s32 3, %v429_v7 }
  0x31   :  { %p3483_p5 = por %p3482_p4, %p3481_p3 }
  0x32   :  { %2993 = vmatpush3.bf16.msra.mxu1 %v3266_v8  ;;  %v291_v8 = vld [vmem:[#allocation5 + $0x30] sm:$0xf] }
  0x33   :  { %2994 = vmatprep.subr.bf16.mxu1 %v3510_v0  ;;  %p3484_p6 = pnand %p3483_p5, %p3477_p2 }
  0x34   :  { %2979 = vmatpush3.bf16.xpose.msra.mxu0 %v3270_v12  ;;  %v797_v12 = vsub.s32 2, %v429_v7 }
  0x35   :  { %3002 = vmatprep.subr.bf16.mxu0 %v3271_v5 }
  0x36   :  { %2995 = vmatpush3.bf16.msra.mxu1 %v3267_v9  ;;  %v553_v9 = vsub.s32 1, %v429_v7 }
  0x37   :  { %2996 = vmatprep.subr.bf16.mxu1 %v3510_v0 }
  0x3a   :  { %2997 = vmatpush3.bf16.msra.mxu1 %v3268_v10  ;;  %v430_v10 = vsub.s32 0, %v429_v7 }
  0xaa   :  { %v53_v15 = vpop.permute.xlu0 %52 }
  0xab   :  { %vm57_vm2 = vcmp.eq.s32.totalorder %v50_v14, %v53_v15  ;;  %v3609_v15 = vrot.slane %v291_v8, %v430_v10 }
  0xae   :  { %v56_v16 = vpop.permute.xlu0 %55 }
  0xaf   :  { %vm58_vm3 = vcmp.eq.s32.totalorder %v50_v14, %v56_v16  ;;  %v3607_v14 = vrot.slane %v291_v8, %v553_v9  ;;  %v3615_v16 = vrot.slane %v291_v8, %v980_v11 }
  0xb0   :  { %vm2773_vm4 = vmpackc.low %vm58_vm3, %vm57_vm2 }
  0xb1   :  { %2981 = vmatmul.mubr.msk.bf16.vlgmr.msra.gmra.mrb[0].mxu0 %vm2773_vm4, %v3513_v17  ;;  %v3617_v17 = vrot.slane %v291_v8, %v797_v12 }
  0xb2   :  { %3003 = vmatpush3.bf16.msra.mxu0 %v3271_v5 }
  0xb3   :  { %3004 = vmatprep.subr.bf16.mxu0 %v3272_v6 }
  0xb6   :  { %3005 = vmatpush3.bf16.msra.mxu0 %v3272_v6 }
 0x100   :  { %v174_v19 = vpop.f32.mrb[0].mxu1 }
 0x101   :  { %v175_v20 = vadd.f32 %v2775_v18, %v174_v19  ;;  %v2988_v21 = vpop.f32.mrb[1].mxu1 }
 0x102   :  { %v177_v22 = vpop.f32.mrb[2].mxu1 }
 0x103   :  { %3289 = vtanh.f32 %v175_v20  ;;  %v2989_v23 = vpop.f32.mrb[3].mxu1 }
 0x10d   :  { %v3290_v24 = vpop.eup %3289 }
 0x10e   :  { %v181_v25 = vpack.c.bf16 %v3290_v24, %v3290_v24 }
 0x110   :  { %2999 = vmatmul.mubr.msk.bf16.vlgmr.msra.gmra.mrb[4].mxu1 %vm219_vm5, %v181_v25 }
 0x184   :  { %v114_v26 = vpop.f32.mrb[0].mxu0 }
 0x185   :  { %v2982_v27 = vpop.f32.mrb[1].mxu0  ;;  %v3587_v40 = vadd.f32 %v283_v39, %v114_v26 }
 0x186   :  { %v117_v28 = vpop.f32.mrb[2].mxu0 }
 0x187   :  { %v2983_v29 = vpop.f32.mrb[3].mxu0  ;;  %v298_v42 = vsel %vm294_vm6, %v3587_v40, 0.0  ;;  %v3591_v43 = vadd.f32 %v284_v41, %v117_v28  ;;  %v2784_v28 = vld [vmem:[#allocation5 + $0x38] ss:$0 sm:$0xff] }
 0x189   :  { %v301_v44 = vsel %vm294_vm6, %v3591_v43, 0.0 }
 0x1e3   :  { %v257_v31 = vpop.f32.mrb[4].mxu1 }
 0x1e4   :  { %v258_v32 = vadd.f32 %v2778_v30, %v257_v31  ;;  %v3000_v33 = vpop.f32.mrb[5].mxu1 }
 0x1e5   :  { %v260_v34 = vpop.f32.mrb[6].mxu1 }
 0x1e6   :  { %v3001_v35 = vpop.f32.mrb[7].mxu1  ;;  %v264_v36 = vrot.slane %v258_v32, 6  ;;  %v272_v37 = vrot.slane %v258_v32, 2  ;;  %v268_v38 = vrot.slane %v258_v32, 4 }
 0x1e8   :  { %265 = vrot.lane.b32.xlu1 %v264_v36, %s3514_s0  ;;  %273 = vrot.lane.b32.xlu0 %v272_v37, %s3515_s1 }
 0x1ec   :  { %269 = vrot.lane.b32.xlu1 %v268_v38, %s3505_s25 }
 0x207   :  { %299 = vadd.xlane.f32.xlu0 %v298_v42 }
 0x20b   :  { %302 = vadd.xlane.f32.xlu0 %v301_v44  ;;  %v2786_v44 = vld [vmem:[#allocation5 + $0x3a] ss:$0 sm:$0xff] }
 0x25a   :  { %v266_v45 = vpop.permute.xlu1 %265  ;;  %v274_v49 = vpop.permute.xlu0 %273 }
 0x25b   :  { %v277_v46 = vsel %vm276_vm7, %v258_v32, %v266_v45  ;;  %v2785_v32 = vld [vmem:[#allocation5 + $0x39] ss:$0 sm:$0xff] }
 0x25e   :  { %v270_v47 = vpop.permute.xlu1 %269 }
 0x25f   :  { %v279_v50 = vsel %vm278_vm8, %v277_v46, %v270_v47 }
 0x260   :  { %v281_v51 = vsel %vm280_vm9, %v279_v50, %v274_v49 }
 0x261   :  { %v3596_v52 = vadd.f32 %v282_v48, %v281_v51 }
 0x263   :  { %v295_v53 = vsel %vm294_vm6, %v3596_v52, 0.0 }
 0x264   :  { %296 = vadd.xlane.f32.xlu1 %v295_v53 }
 0x294   :  { %v300_v54 = vpop.xlane.xlu0 %299 }
 0x295   :  { %v306_v55 = vmul.f32 0.03125, %v300_v54 }
 0x297   :  { %v309_v56 = vsub.f32 %v3587_v40, %v306_v55 }
 0x298   :  { %v303_v59 = vpop.xlane.xlu0 %302 }
 0x299   :  { %v312_v57 = vmul.f32 %v309_v56, %v309_v56  ;;  %v307_v60 = vmul.f32 0.03125, %v303_v59 }
 0x29b   :  { %v317_v58 = vsel %vm294_vm6, %v312_v57, 0.0  ;;  %v310_v63 = vsub.f32 %v3591_v43, %v307_v60 }
 0x29c   :  { %318 = vadd.xlane.f32.xlu0 %v317_v58 }
 0x29d   :  { %v313_v3 = vmul.f32 %v310_v63, %v310_v63 }
 0x29f   :  { %v320_v4 = vsel %vm294_vm6, %v313_v3, 0.0 }
 0x2b2   :  { %556 = vrot.lane.b32.xlu0 %v3607_v14, %s3515_s1 }
 0x2b6   :  { %983 = vrot.lane.b32.xlu0 %v3615_v16, %s3515_s1 }
 0x2f1   :  { %v297_v61 = vpop.xlane.xlu1 %296 }
 0x2f2   :  { %v305_v62 = vmul.f32 0.03125, %v297_v61 }
 0x2f4   :  { %v308_v0 = vsub.f32 %v3596_v52, %v305_v62 }
 0x2f6   :  { %v311_v1 = vmul.f32 %v308_v0, %v308_v0 }
 0x2f8   :  { %v314_v2 = vsel %vm294_vm6, %v311_v1, 0.0 }
 0x2f9   :  { %315 = vadd.xlane.f32.xlu1 %v314_v2 }
 0x2fd   :  { %321 = vadd.xlane.f32.xlu1 %v320_v4 }
 0x30e   :  { %433 = vrot.lane.b32.xlu1 %v3609_v15, %s3515_s1 }
 0x312   :  { %800 = vrot.lane.b32.xlu1 %v3617_v17, %s3515_s1 }
 0x329   :  { %v319_v13 = vpop.xlane.xlu0 %318 }
 0x32a   :  { %v324_v18 = vmul.f32 0.03125, %v319_v13 }
 0x32c   :  { %v327_v19 = vadd.f32 1e-05, %v324_v18 }
 0x32d   :  { %v3629_v49 = vpop.permute.xlu0 %556 }
 0x32e   :  { %3291 = vrsqrt.f32 %v327_v19 }
 0x331   :  { %v3658_v2 = vpop.permute.xlu0 %983 }
 0x338   :  { %v3292_v26 = vpop.eup %3291 }
 0x339   :  { %v333_v27 = vmul.f32 %v3292_v26, %v309_v56 }
 0x33b   :  { %v340_v31 = vmul.f32 %v2784_v28, %v333_v27 }
 0x33d   :  { %v347_v37 = vadd.f32 %v2785_v32, %v340_v31 }
 0x386   :  { %v316_v20 = vpop.xlane.xlu1 %315 }
 0x387   :  { %v323_v21 = vmul.f32 0.03125, %v316_v20 }
 0x389   :  { %v326_v22 = vadd.f32 1e-05, %v323_v21 }
 0x38a   :  { %v322_v23 = vpop.xlane.xlu1 %321 }
 0x38b   :  { %3293 = vrsqrt.f32 %v326_v22  ;;  %v325_v24 = vmul.f32 0.03125, %v322_v23 }
 0x38d   :  { %v328_v25 = vadd.f32 1e-05, %v325_v24 }
 0x38e   :  { %v3625_v45 = vpop.permute.xlu1 %433 }
 0x38f   :  { %3295 = vrsqrt.f32 %v328_v25 }
 0x392   :  { %v3639_v58 = vpop.permute.xlu1 %800 }
 0x395   :  { %v3294_v29 = vpop.eup %3293 }
 0x396   :  { %v332_v30 = vmul.f32 %v3294_v29, %v308_v0 }
 0x398   :  { %v339_v33 = vmul.f32 %v2784_v28, %v332_v30 }
 0x399   :  { %v3296_v34 = vpop.eup %3295 }
 0x39a   :  { %v334_v35 = vmul.f32 %v3296_v34, %v310_v63  ;;  %v346_v36 = vadd.f32 %v2785_v32, %v339_v33 }
 0x39c   :  { %v349_v38 = vpack.c.bf16 %v347_v37, %v346_v36  ;;  %v341_v39 = vmul.f32 %v2784_v28, %v334_v35  ;;  %v290_v37 = vld [vmem:[#allocation5 + $0x10] sm:$0xff] }
 0x39e   :  { %3006 = vmatprep.mubr.msk.bf16.mxu0 %vm294_vm6, %v349_v38  ;;  %v348_v41 = vadd.f32 %v2785_v32, %v341_v39 }
 0x3a0   :  { %v350_v42 = vpack.c.bf16 %v348_v41, %v348_v41 }
 0x3a2   :  { %3007 = vmatmul.mubr.msk.bf16.vlgmr.msra.gmra.mrb[4].mxu0 %vm294_vm6, %v350_v42  ;;  %v289_v42 = vld [vmem:[#allocation5 + $0x8] sm:$0xff] }
 0x475   :  { %v3008_v46 = vpop.f32.mrb[4].mxu0 }
 0x476   :  { %v3627_v47 = vadd.f32 %v3008_v46, %v2786_v44  ;;  %v412_v48 = vpop.f32.mrb[5].mxu0 }
 0x477   :  { %v3631_v50 = vadd.f32 %v2786_v44, %v412_v48  ;;  %v3009_v51 = vpop.f32.mrb[6].mxu0 }
 0x478   :  { %v415_v53 = vpop.f32.mrb[7].mxu0  ;;  %v561_v54 = vmul.f32 %v3629_v49, %v3627_v47  ;;  %v438_v57 = vmul.f32 %v3625_v45, %v3627_v47  ;;  %v805_v1 = vmul.f32 %v3639_v58, %v3627_v47  ;;  %v988_v7 = vmul.f32 %v3658_v2, %v3627_v47  ;;  %v288_v51 = vld [vmem:[#allocation5] sm:$0xff] }
 0x479   :  { %v3635_v55 = vadd.f32 %v2786_v44, %v415_v53  ;;  %v559_v60 = vmul.f32 %v3629_v49, %v3631_v50  ;;  %v436_v3 = vmul.f32 %v3625_v45, %v3631_v50  ;;  %v803_v8 = vmul.f32 %v3639_v58, %v3631_v50 }
 0x47a   :  { %v563_v56 = vpack.c.bf16 %v561_v54, %v561_v54  ;;  %v440_v0 = vpack.c.bf16 %v438_v57, %v438_v57  ;;  %v807_v6 = vpack.c.bf16 %v805_v1, %v805_v1  ;;  %v990_v11 = vpack.c.bf16 %v988_v7, %v988_v7 }
 0x47b   :  { %v3643_v59 = vpack.c.bf16 %v3635_v55, %v3631_v50  ;;  %v560_v61 = vmul.f32 %v3629_v49, %v3635_v55  ;;  %v437_v63 = vmul.f32 %v3625_v45, %v3635_v55  ;;  %v804_v5 = vmul.f32 %v3639_v58, %v3635_v55 }
 0x47c   :  { %568 = vrot.lane.b32.xlu0 %v563_v56, %s3514_s0  ;;  %v987_v10 = vmul.f32 %v3658_v2, %v3635_v55  ;;  %v986_v12 = vmul.f32 %v3658_v2, %v3631_v50  ;;  %v427_v28 = vpack.c.bf16 %v3627_v47, %v3627_v47 }
 0x47d   :  { %3014 = vmatprep.mubr.msk.bf16.mxu1 %vm294_vm6, %v3643_v59  ;;  %3022 = vmatprep.mubr.msk.bf16.mxu0 %vm294_vm6, %v3643_v59  ;;  %v562_v62 = vpack.c.bf16 %v560_v61, %v559_v60  ;;  %v439_v4 = vpack.c.bf16 %v437_v63, %v436_v3  ;;  %v806_v9 = vpack.c.bf16 %v804_v5, %v803_v8 }
 0x47e   :  { %v989_v13 = vpack.c.bf16 %v987_v10, %v986_v12 }
 0x47f   :  { %566 = vrot.lane.b32.xlu1 %v562_v62, %s3514_s0 }
 0x480   :  { %445 = vrot.lane.b32.xlu0 %v440_v0, %s3514_s0 }
 0x483   :  { %443 = vrot.lane.b32.xlu1 %v439_v4, %s3514_s0 }
 0x484   :  { %812 = vrot.lane.b32.xlu0 %v807_v6, %s3514_s0 }
 0x487   :  { %810 = vrot.lane.b32.xlu1 %v806_v9, %s3514_s0 }
 0x488   :  { %995 = vrot.lane.b32.xlu0 %v990_v11, %s3514_s0 }
 0x48b   :  { %993 = vrot.lane.b32.xlu1 %v989_v13, %s3514_s0 }
 0x48c   :  { %659 = vrot.lane.b32.xlu0 %v3607_v14, %s3505_s25 }
 0x48f   :  { %543 = vrot.lane.b32.xlu1 %v3609_v15, %s3505_s25 }
 0x490   :  { %1086 = vrot.lane.b32.xlu0 %v3615_v16, %s3505_s25 }
 0x493   :  { %903 = vrot.lane.b32.xlu1 %v3617_v17, %s3505_s25 }
 0x4ee   :  { %v569_v18 = vpop.permute.xlu0 %568 }
 0x4ef   :  { %v574_v17 = vsel %vm294_vm6, %v569_v18, 0 }
 0x4f1   :  { %v567_v19 = vpop.permute.xlu1 %566 }
 0x4f2   :  { %3228 = vmatprep.subr.msk.bf16.mxu0 %vm294_vm6, %v567_v19  ;;  %v446_v20 = vpop.permute.xlu0 %445  ;;  %v571_v21 = vsel %vm294_vm6, %v567_v19, 0 }
 0x4f3   :  { %3019 = vmatpush3.bf16.xpose.msra.mxu0 %v571_v21  ;;  %v457_v25 = vsel %vm294_vm6, %v446_v20, 0 }
 0x4f4   :  { %3229 = vmatprep.subr.msk.bf16.mxu0 %vm294_vm6, %v569_v18 }
 0x4f5   :  { %v444_v14 = vpop.permute.xlu1 %443 }
 0x4f6   :  { %3226 = vmatprep.subr.msk.bf16.mxu1 %vm294_vm6, %v444_v14  ;;  %v813_v15 = vpop.permute.xlu0 %812  ;;  %v454_v22 = vsel %vm294_vm6, %v444_v14, 0 }
 0x4f7   :  { %3011 = vmatpush3.bf16.xpose.msra.mxu1 %v454_v22  ;;  %v818_v31 = vsel %vm294_vm6, %v813_v15, 0 }
 0x4f8   :  { %3227 = vmatprep.subr.msk.bf16.mxu1 %vm294_vm6, %v446_v20 }
 0x4f9   :  { %v811_v23 = vpop.permute.xlu1 %810 }
 0x4fa   :  { %v996_v16 = vpop.permute.xlu0 %995  ;;  %v815_v30 = vsel %vm294_vm6, %v811_v23, 0 }
 0x4fb   :  { %3021 = vmatpush3.bf16.xpose.msra.mxu0 %v574_v17  ;;  %v1001_v34 = vsel %vm294_vm6, %v996_v16, 0 }
 0x4fc   :  { %3232 = vmatprep.subr.msk.bf16.mxu0 %vm294_vm6, %v811_v23 }
 0x4fd   :  { %v994_v32 = vpop.permute.xlu1 %993 }
 0x4fe   :  { %v3695_v24 = vpop.permute.xlu0 %659  ;;  %v998_v33 = vsel %vm294_vm6, %v994_v32, 0 }
 0x4ff   :  { %3013 = vmatpush3.bf16.xpose.msra.mxu1 %v457_v25  ;;  %v662_v26 = vmul.f32 %v3695_v24, %v3631_v50  ;;  %v663_v27 = vmul.f32 %v3695_v24, %v3635_v55 }
 0x501   :  { %v665_v29 = vpack.c.bf16 %v663_v27, %v662_v26 }
 0x502   :  { %3023 = vmatmul.mubr.msk.bf16.vlgmr.msra.gmra.mrb[8].mxu0 %vm294_vm6, %v427_v28  ;;  %v3720_v35 = vpop.permute.xlu0 %1086 }
 0x503   :  { %3043 = vmatpush3.bf16.xpose.msra.mxu0 %v815_v30  ;;  %3046 = vmatprep.mubr.msk.bf16.mxu0 %vm294_vm6, %v3643_v59 }
 0x504   :  { %669 = vrot.lane.b32.xlu0 %v665_v29, %s3505_s25  ;;  %3233 = vmatprep.subr.msk.bf16.mxu0 %vm294_vm6, %v813_v15  ;;  %v664_v15 = vmul.f32 %v3695_v24, %v3627_v47 }
 0x506   :  { %3015 = vmatmul.mubr.msk.bf16.vlgmr.msra.gmra.mrb[8].mxu1 %vm294_vm6, %v427_v28  ;;  %v666_v17 = vpack.c.bf16 %v664_v15, %v664_v15 }
 0x50b   :  { %3045 = vmatpush3.bf16.xpose.msra.mxu0 %v818_v31 }
 0x50c   :  { %3235 = vmatprep.subr.msk.bf16.mxu0 %vm294_vm6, %v994_v32 }
 0x512   :  { %3047 = vmatmul.mubr.msk.bf16.vlgmr.msra.gmra.mrb[12].mxu0 %vm294_vm6, %v427_v28 }
 0x513   :  { %3059 = vmatpush3.bf16.xpose.msra.mxu0 %v998_v33  ;;  %3062 = vmatprep.mubr.msk.bf16.mxu0 %vm294_vm6, %v3643_v59 }
 0x514   :  { %3236 = vmatprep.subr.msk.bf16.mxu0 %vm294_vm6, %v996_v16  ;;  %v3760_v16 = vpop.permute.xlu1 %543 }
 0x515   :  { %v546_v23 = vmul.f32 %v3760_v16, %v3631_v50  ;;  %v547_v25 = vmul.f32 %v3760_v16, %v3635_v55  ;;  %v548_v33 = vmul.f32 %v3760_v16, %v3627_v47 }
 0x517   :  { %v549_v26 = vpack.c.bf16 %v547_v25, %v546_v23 }
 0x51b   :  { %3061 = vmatpush3.bf16.xpose.msra.mxu0 %v1001_v34  ;;  %v550_v34 = vpack.c.bf16 %v548_v33, %v548_v33 }
 0x522   :  { %3063 = vmatmul.mubr.msk.bf16.vlgmr.msra.gmra.mrb[16].mxu0 %vm294_vm6, %v427_v28 }
 0x576   :  { %v670_v36 = vpop.permute.xlu0 %669 }
 0x577   :  { %3026 = vmatprep.subr.bf16.mxu1 %v670_v36 }
 0x578   :  { %3027 = vmatpush3.bf16.msra.mxu1 %v670_v36  ;;  %v3783_v36 = vpop.permute.xlu1 %903 }
 0x579   :  { %v906_v15 = vmul.f32 %v3783_v36, %v3631_v50  ;;  %v908_v23 = vmul.f32 %v3783_v36, %v3627_v47 }
 0x57b   :  { %v910_v25 = vpack.c.bf16 %v908_v23, %v908_v23 }
 0x5d5   :  { %v3024_v38 = vpop.f32.mrb[8].mxu0 }
 0x5d6   :  { %v3722_v39 = vadd.f32 %v3024_v38, %v290_v37  ;;  %v610_v41 = vpop.f32.mrb[9].mxu0 }
 0x5d7   :  { %v3025_v44 = vpop.f32.mrb[10].mxu0  ;;  %v3732_v61 = vadd.f32 %v610_v41, %v288_v51 }
 0x5d8   :  { %v613_v46 = vpop.f32.mrb[11].mxu0  ;;  %v630_v48 = vsel %vm507_vm10, %v3722_v39, -inf }
 0x5d9   :  { %v3726_v53 = vadd.f32 %v613_v46, %v289_v42  ;;  %v3016_v54 = vpop.f32.mrb[8].mxu1  ;;  %631 = vmax.xlane.f32.xlu0 %v630_v48  ;;  %v624_v4 = vsel %vm507_vm10, %v3732_v61, -inf }
 0x5da   :  { %v3728_v56 = vadd.f32 %v3016_v54, %v290_v37  ;;  %v493_v57 = vpop.f32.mrb[9].mxu1 }
 0x5db   :  { %v3017_v59 = vpop.f32.mrb[10].mxu1  ;;  %v627_v60 = vsel %vm507_vm10, %v3726_v53, -inf  ;;  %v3740_v3 = vadd.f32 %v493_v57, %v288_v51 }
 0x5dc   :  { %v496_v62 = vpop.f32.mrb[11].mxu1  ;;  %v514_v63 = vsel %vm507_vm10, %v3728_v56, -inf }
 0x5dd   :  { %v3736_v0 = vadd.f32 %v496_v62, %v289_v42  ;;  %515 = vmax.xlane.f32.xlu1 %v514_v63  ;;  %628 = vmax.xlane.f32.xlu0 %v627_v60  ;;  %v508_v5 = vsel %vm507_vm10, %v3740_v3, -inf }
 0x5df   :  { %v511_v1 = vsel %vm507_vm10, %v3736_v0, -inf }
 0x5e1   :  { %625 = vmax.xlane.f32.xlu1 %v624_v4  ;;  %512 = vmax.xlane.f32.xlu0 %v511_v1 }
 0x5e5   :  { %509 = vmax.xlane.f32.xlu1 %v508_v5  ;;  %v3048_v6 = vpop.f32.mrb[12].mxu0 }
 0x5e6   :  { %v3746_v7 = vadd.f32 %v3048_v6, %v290_v37  ;;  %v854_v8 = vpop.f32.mrb[13].mxu0 }
 0x5e7   :  { %v3049_v9 = vpop.f32.mrb[14].mxu0  ;;  %v3748_v10 = vadd.f32 %v854_v8, %v288_v51 }
 0x5e8   :  { %v857_v11 = vpop.f32.mrb[15].mxu0  ;;  %v874_v12 = vsel %vm507_vm10, %v3746_v7, -inf }
 0x5e9   :  { %v3752_v13 = vadd.f32 %v857_v11, %v289_v42  ;;  %875 = vmax.xlane.f32.xlu0 %v874_v12  ;;  %v868_v19 = vsel %vm507_vm10, %v3748_v10, -inf }
 0x5eb   :  { %v871_v18 = vsel %vm507_vm10, %v3752_v13, -inf }
 0x5ec   :  { %872 = vmax.xlane.f32.xlu1 %v871_v18 }
 0x5ed   :  { %869 = vmax.xlane.f32.xlu0 %v868_v19 }
 0x5f5   :  { %v3064_v20 = vpop.f32.mrb[16].mxu0 }
 0x5f6   :  { %v1037_v21 = vpop.f32.mrb[17].mxu0  ;;  %v3768_v27 = vadd.f32 %v3064_v20, %v290_v37 }
 0x5f7   :  { %v3065_v14 = vpop.f32.mrb[18].mxu0  ;;  %v3772_v29 = vadd.f32 %v1037_v21, %v288_v51 }
 0x5f8   :  { %v1040_v22 = vpop.f32.mrb[19].mxu0  ;;  %v1057_v30 = vsel %vm507_vm10, %v3768_v27, -inf }
 0x5f9   :  { %v3770_v28 = vadd.f32 %v1040_v22, %v289_v42  ;;  %v1051_v32 = vsel %vm507_vm10, %v3772_v29, -inf  ;;  %v907_v22 = vmul.f32 %v3783_v36, %v3635_v55 }
 0x5fb   :  { %v1054_v31 = vsel %vm507_vm10, %v3770_v28, -inf }
 0x5fd   :  { %671 = vrot.lane.b32.xlu1 %v666_v17, %s3505_s25  ;;  %v909_v17 = vpack.c.bf16 %v907_v22, %v906_v15 }
 0x603   :  { %733 = vrot.lane.b32.xlu0 %v549_v26, %s3505_s25 }
 0x621   :  { %1058 = vmax.xlane.f32.xlu1 %v1057_v30 }
 0x622   :  { %1055 = vmax.xlane.f32.xlu0 %v1054_v31 }
 0x625   :  { %1052 = vmax.xlane.f32.xlu1 %v1051_v32 }
 0x638   :  { %735 = vrot.lane.b32.xlu0 %v550_v34, %s3505_s25 }
 0x666   :  { %v632_v37 = vpop.xlane.xlu0 %631 }
 0x667   :  { %v635_v38 = vsub.f32 %v3722_v39, %v632_v37 }
 0x669   :  { %v640_v41 = vmul.f32 1.442695, %v635_v38 }
 0x66a   :  { %v516_v42 = vpop.xlane.xlu1 %515  ;;  %v629_v44 = vpop.xlane.xlu0 %628 }
 0x66b   :  { %3297 = vpow2.f32 %v640_v41  ;;  %v519_v46 = vsub.f32 %v3728_v56, %v516_v42  ;;  %v634_v48 = vsub.f32 %v3726_v53, %v629_v44 }
 0x66d   :  { %v524_v51 = vmul.f32 1.442695, %v519_v46  ;;  %v638_v54 = vmul.f32 1.442695, %v634_v48 }
 0x66e   :  { %v626_v57 = vpop.xlane.xlu1 %625  ;;  %v513_v59 = vpop.xlane.xlu0 %512 }
 0x66f   :  { %3299 = vpow2.f32 %v524_v51  ;;  %v633_v60 = vsub.f32 %v3732_v61, %v626_v57  ;;  %v518_v62 = vsub.f32 %v3736_v0, %v513_v59 }
 0x670   :  { %3301 = vpow2.f32 %v638_v54 }
 0x671   :  { %v636_v63 = vmul.f32 1.442695, %v633_v60  ;;  %v522_v39 = vmul.f32 1.442695, %v518_v62 }
 0x672   :  { %v510_v4 = vpop.xlane.xlu1 %509 }
 0x673   :  { %3303 = vpow2.f32 %v636_v63  ;;  %v517_v26 = vsub.f32 %v3740_v3, %v510_v4 }
 0x674   :  { %3305 = vpow2.f32 %v522_v39 }
 0x675   :  { %v3790_v1 = vpop.eup %3297  ;;  %v520_v30 = vmul.f32 1.442695, %v517_v26 }
 0x676   :  { %v876_v56 = vpop.xlane.xlu0 %875  ;;  %v648_v53 = vsel %vm507_vm10, %v3790_v1, 0.0 }
 0x677   :  { %649 = vadd.xlane.f32.xlu0 %v648_v53  ;;  %v879_v31 = vsub.f32 %v3746_v7, %v876_v56  ;;  %3307 = vpow2.f32 %v520_v30 }
 0x679   :  { %v3794_v5 = vpop.eup %3299  ;;  %v873_v6 = vpop.xlane.xlu1 %872  ;;  %v884_v32 = vmul.f32 1.442695, %v879_v31 }
 0x67a   :  { %v3796_v8 = vpop.eup %3301  ;;  %v870_v61 = vpop.xlane.xlu0 %869  ;;  %v532_v0 = vsel %vm507_vm10, %v3794_v5, 0.0  ;;  %v878_v34 = vsub.f32 %v3752_v13, %v873_v6  ;;  %v1089_v6 = vmul.f32 %v3720_v35, %v3631_v50 }
 0x67b   :  { %533 = vadd.xlane.f32.xlu1 %v532_v0  ;;  %v645_v9 = vsel %vm507_vm10, %v3796_v8, 0.0  ;;  %v877_v33 = vsub.f32 %v3748_v10, %v870_v61  ;;  %3309 = vpow2.f32 %v884_v32  ;;  %v1090_v61 = vmul.f32 %v3720_v35, %v3635_v55 }
 0x67c   :  { %646 = vadd.xlane.f32.xlu0 %v645_v9  ;;  %v882_v38 = vmul.f32 1.442695, %v878_v34  ;;  %v1091_v9 = vmul.f32 %v3720_v35, %v3627_v47 }
 0x67d   :  { %v3802_v11 = vpop.eup %3303  ;;  %v672_v12 = vpop.permute.xlu1 %671  ;;  %v880_v37 = vmul.f32 1.442695, %v877_v33  ;;  %v1092_v0 = vpack.c.bf16 %v1090_v61, %v1089_v6 }
 0x67e   :  { %v3804_v18 = vpop.eup %3305  ;;  %v681_v19 = vsel %vm278_vm8, %v672_v12, 0  ;;  %3230 = vmatprep.subr.msk.bf16.mxu1 %vm278_vm8, %v672_v12  ;;  %v3808_v20 = vpop.permute.xlu0 %733  ;;  %v642_v21 = vsel %vm507_vm10, %v3802_v11, 0.0  ;;  %v1093_v12 = vpack.c.bf16 %v1091_v9, %v1091_v9 }
 0x67f   :  { %643 = vadd.xlane.f32.xlu1 %v642_v21  ;;  %3029 = vmatpush3.bf16.msra.mxu1 %v681_v19  ;;  %v529_v14 = vsel %vm507_vm10, %v3804_v18, 0.0  ;;  %3311 = vpow2.f32 %v880_v37 }
 0x680   :  { %530 = vadd.xlane.f32.xlu0 %v529_v14  ;;  %3034 = vmatprep.subr.bf16.mxu1 %v3808_v20  ;;  %3313 = vpow2.f32 %v882_v38 }
 0x681   :  { %v3828_v46 = vpop.eup %3307 }
 0x682   :  { %v526_v13 = vsel %vm507_vm10, %v3828_v46, 0.0 }
 0x685   :  { %v3834_v54 = vpop.eup %3309 }
 0x690   :  { %913 = vrot.lane.b32.xlu1 %v909_v17, %s3505_s25 }
 0x696   :  { %915 = vrot.lane.b32.xlu0 %v910_v25, %s3505_s25 }
 0x6ae   :  { %v1059_v41 = vpop.xlane.xlu1 %1058 }
 0x6af   :  { %v1062_v42 = vsub.f32 %v3768_v27, %v1059_v41  ;;  %v1056_v44 = vpop.xlane.xlu0 %1055  ;;  %v892_v27 = vsel %vm507_vm10, %v3834_v54, 0.0 }
 0x6b0   :  { %v1061_v3 = vsub.f32 %v3770_v28, %v1056_v44  ;;  %v3838_v28 = vpop.eup %3311 }
 0x6b1   :  { %v1067_v48 = vmul.f32 1.442695, %v1062_v42  ;;  %v886_v59 = vsel %vm507_vm10, %v3838_v28, 0.0  ;;  %v3842_v60 = vpop.eup %3313 }
 0x6b2   :  { %v1065_v7 = vmul.f32 1.442695, %v1061_v3  ;;  %v1053_v51 = vpop.xlane.xlu1 %1052  ;;  %v889_v63 = vsel %vm507_vm10, %v3842_v60, 0.0 }
 0x6b3   :  { %3315 = vpow2.f32 %v1067_v48  ;;  %v1060_v10 = vsub.f32 %v3772_v29, %v1053_v51  ;;  %v736_v19 = vpop.permute.xlu0 %735 }
 0x6b4   :  { %527 = vadd.xlane.f32.xlu1 %v526_v13  ;;  %3317 = vpow2.f32 %v1065_v7  ;;  %v745_v31 = vsel %vm278_vm8, %v736_v19, 0 }
 0x6b5   :  { %v1063_v57 = vmul.f32 1.442695, %v1060_v10 }
 0x6b7   :  { %3319 = vpow2.f32 %v1063_v57 }
 0x6b8   :  { %893 = vadd.xlane.f32.xlu1 %v892_v27 }
 0x6bc   :  { %887 = vadd.xlane.f32.xlu1 %v886_v59 }
 0x6bd   :  { %v3844_v29 = vpop.eup %3315 }
 0x6be   :  { %v1075_v62 = vsel %vm507_vm10, %v3844_v29, 0.0  ;;  %v3850_v39 = vpop.eup %3317 }
 0x6bf   :  { %1076 = vadd.xlane.f32.xlu0 %v1075_v62  ;;  %v1072_v53 = vsel %vm507_vm10, %v3850_v39, 0.0 }
 0x6c0   :  { %890 = vadd.xlane.f32.xlu1 %v889_v63 }
 0x6c1   :  { %v3852_v4 = vpop.eup %3319 }
 0x6c2   :  { %v1069_v56 = vsel %vm507_vm10, %v3852_v4, 0.0 }
 0x6c3   :  { %1070 = vadd.xlane.f32.xlu0 %v1069_v56 }
 0x6c4   :  { %1073 = vadd.xlane.f32.xlu1 %v1072_v53 }
 0x6d5   :  { %1096 = vrot.lane.b32.xlu1 %v1092_v0, %s3505_s25 }
 0x6d9   :  { %1098 = vrot.lane.b32.xlu0 %v1093_v12, %s3505_s25 }
 0x704   :  { %v650_v21 = vpop.xlane.xlu0 %649 }
 0x705   :  { %3321 = vrcp.f32 %v650_v21 }
 0x708   :  { %v534_v14 = vpop.xlane.xlu1 %533 }
 0x709   :  { %v647_v15 = vpop.xlane.xlu0 %646 }
 0x70a   :  { %3323 = vrcp.f32 %v647_v15 }
 0x70c   :  { %v644_v22 = vpop.xlane.xlu1 %643 }
 0x70d   :  { %3325 = vrcp.f32 %v644_v22 }
 0x70e   :  { %3327 = vrcp.f32 %v534_v14 }
 0x70f   :  { %v3322_v50 = vpop.eup %3321 }
 0x710   :  { %v656_v23 = vmul.f32 %v3322_v50, %v3790_v1  ;;  %v914_v32 = vpop.permute.xlu1 %913  ;;  %v531_v1 = vpop.xlane.xlu0 %530 }
 0x711   :  { %3329 = vrcp.f32 %v531_v1 }
 0x712   :  { %v658_v30 = vpack.c.bf16 %v656_v23, %v656_v23 }
 0x714   :  { %v3324_v17 = vpop.eup %3323  ;;  %v916_v33 = vpop.permute.xlu0 %915 }
 0x715   :  { %v655_v25 = vmul.f32 %v3324_v17, %v3796_v8 }
 0x717   :  { %v3326_v55 = vpop.eup %3325 }
 0x718   :  { %v654_v47 = vmul.f32 %v3326_v55, %v3802_v11  ;;  %v3328_v34 = vpop.eup %3327 }
 0x71a   :  { %v657_v26 = vpack.c.bf16 %v655_v25, %v654_v47 }
 0x71b   :  { %v3330_v38 = vpop.eup %3329 }
 0x71c   :  { %3030 = vmatprep.mubr.msk.bf16.mxu1 %vm507_vm10, %v657_v26  ;;  %v539_v48 = vmul.f32 %v3330_v38, %v3804_v18 }
 0x71d   :  { %3031 = vmatmul.mubr.msk.bf16.vlgmr.msra.gmra.mrb[12].mxu1 %vm507_vm10, %v658_v30 }
 0x71e   :  { %3035 = vmatpush3.bf16.msra.mxu1 %v3808_v20  ;;  %v540_v20 = vmul.f32 %v3328_v34, %v3794_v5 }
 0x71f   :  { %3231 = vmatprep.subr.msk.bf16.mxu1 %vm278_vm8, %v736_v19 }
 0x720   :  { %v542_v10 = vpack.c.bf16 %v540_v20, %v540_v20 }
 0x722   :  { %3037 = vmatpush3.bf16.msra.mxu1 %v745_v31 }
 0x723   :  { %3050 = vmatprep.subr.bf16.mxu1 %v914_v32 }
 0x741   :  { %v528_v11 = vpop.xlane.xlu1 %527 }
 0x742   :  { %3331 = vrcp.f32 %v528_v11 }
 0x745   :  { %v894_v8 = vpop.xlane.xlu1 %893 }
 0x746   :  { %3333 = vrcp.f32 %v894_v8 }
 0x749   :  { %v888_v37 = vpop.xlane.xlu1 %887 }
 0x74a   :  { %3335 = vrcp.f32 %v888_v37 }
 0x74c   :  { %v3332_v41 = vpop.eup %3331  ;;  %v1077_v42 = vpop.xlane.xlu0 %1076 }
 0x74d   :  { %v891_v44 = vpop.xlane.xlu1 %890  ;;  %v538_v3 = vmul.f32 %v3332_v41, %v3828_v46  ;;  %v925_v46 = vsel %vm278_vm8, %v916_v33, 0 }
 0x74e   :  { %3337 = vrcp.f32 %v891_v44 }
 0x74f   :  { %v541_v7 = vpack.c.bf16 %v539_v48, %v538_v3 }
 0x750   :  { %v1071_v51 = vpop.xlane.xlu0 %1070  ;;  %v3334_v5 = vpop.eup %3333 }
 0x751   :  { %3339 = vrcp.f32 %v1071_v51  ;;  %v1074_v13 = vpop.xlane.xlu1 %1073  ;;  %3038 = vmatprep.mubr.msk.bf16.mxu1 %vm507_vm10, %v541_v7  ;;  %v900_v59 = vmul.f32 %v3334_v5, %v3834_v54 }
 0x752   :  { %3341 = vrcp.f32 %v1074_v13  ;;  %3039 = vmatmul.mubr.msk.bf16.vlgmr.msra.gmra.mrb[12].mxu1 %vm507_vm10, %v542_v10 }
 0x753   :  { %3051 = vmatpush3.bf16.msra.mxu1 %v914_v32  ;;  %3343 = vrcp.f32 %v1077_v42  ;;  %v902_v61 = vpack.c.bf16 %v900_v59, %v900_v59 }
 0x754   :  { %3234 = vmatprep.subr.msk.bf16.mxu1 %vm278_vm8, %v916_v33  ;;  %v3336_v27 = vpop.eup %3335  ;;  %v1099_v12 = vpop.permute.xlu0 %1098 }
 0x755   :  { %v1097_v57 = vpop.permute.xlu1 %1096  ;;  %v898_v62 = vmul.f32 %v3336_v27, %v3838_v28  ;;  %v3273_v28 = vld [vmem:[#allocation2 + $0x48] sm:$0xff]   ;;  %v3276_v27 = vld [vmem:[#allocation2 + $0x60] sm:$0xff]  }
 0x757   :  { %3053 = vmatpush3.bf16.msra.mxu1 %v925_v46 }
 0x758   :  { %v3338_v18 = vpop.eup %3337  ;;  %3066 = vmatprep.subr.bf16.mxu1 %v1097_v57 }
 0x759   :  { %v899_v63 = vmul.f32 %v3338_v18, %v3842_v60  ;;  %v1108_v60 = vsel %vm278_vm8, %v1099_v12, 0 }
 0x75b   :  { %v3340_v56 = vpop.eup %3339  ;;  %v901_v53 = vpack.c.bf16 %v899_v63, %v898_v62 }
 0x75c   :  { %v3342_v6 = vpop.eup %3341  ;;  %v1081_v0 = vmul.f32 %v3340_v56, %v3852_v4 }
 0x75d   :  { %3054 = vmatprep.mubr.msk.bf16.mxu1 %vm507_vm10, %v901_v53  ;;  %v1082_v9 = vmul.f32 %v3342_v6, %v3850_v39  ;;  %v3344_v19 = vpop.eup %3343  ;;  %v3274_v39 = vld [vmem:[#allocation2 + $0x50] sm:$0xff]  }
 0x75e   :  { %3055 = vmatmul.mubr.msk.bf16.vlgmr.msra.gmra.mrb[12].mxu1 %vm507_vm10, %v902_v61  ;;  %v1083_v4 = vmul.f32 %v3344_v19, %v3844_v29  ;;  %v2811_v29 = vld [vmem:[#allocation5 + $0x3b] ss:$0 sm:$0xff] }
 0x75f   :  { %3067 = vmatpush3.bf16.msra.mxu1 %v1097_v57  ;;  %v1084_v54 = vpack.c.bf16 %v1082_v9, %v1081_v0  ;;  %v3275_v57 = vld [vmem:[#allocation2 + $0x58] sm:$0xff]   ;;  %v2812_v9 = vld [vmem:[#allocation5 + $0x3c] ss:$0 sm:$0xff] }
 0x760   :  { %3237 = vmatprep.subr.msk.bf16.mxu1 %vm278_vm8, %v1099_v12  ;;  %v1085_v21 = vpack.c.bf16 %v1083_v4, %v1083_v4  ;;  %3082 = vmatprep.subr.bf16.mxu0 %v3275_v57 }
 0x761   :  { %3070 = vmatprep.mubr.msk.bf16.mxu1 %vm507_vm10, %v1084_v54  ;;  %3083 = vmatpush3.bf16.msra.mxu0 %v3275_v57 }
 0x762   :  { %3084 = vmatprep.subr.bf16.mxu0 %v3276_v27 }
 0x763   :  { %3069 = vmatpush3.bf16.msra.mxu1 %v1108_v60  ;;  %v2813_v60 = vld [vmem:[#allocation5 + $0x3d] ss:$0 sm:$0xff] }
 0x764   :  { %3074 = vmatprep.subr.bf16.mxu1 %v3273_v28 }
 0x765   :  { %3085 = vmatpush3.bf16.msra.mxu0 %v3276_v27 }
 0x76a   :  { %3071 = vmatmul.mubr.msk.bf16.vlgmr.msra.gmra.mrb[12].mxu1 %vm507_vm10, %v1085_v21 }
 0x76b   :  { %3075 = vmatpush3.bf16.msra.mxu1 %v3273_v28 }
 0x76c   :  { %3076 = vmatprep.subr.bf16.mxu1 %v3274_v39 }
 0x76f   :  { %3077 = vmatpush3.bf16.msra.mxu1 %v3274_v39 }
 0x83d   :  { %v3072_v14 = vpop.f32.mrb[12].mxu1 }
 0x83e   :  { %v1144_v15 = vpop.f32.mrb[13].mxu1  ;;  %v1162_v55 = vpack.c.bf16 %v3072_v14, %v3072_v14 }
 0x83f   :  { %v3073_v22 = vpop.f32.mrb[14].mxu1 }
 0x840   :  { %v1147_v50 = vpop.f32.mrb[15].mxu1 }
 0x841   :  { %v1161_v17 = vpack.c.bf16 %v1147_v50, %v1144_v15 }
 0x843   :  { %3078 = vmatprep.mubr.msk.bf16.mxu1 %vm294_vm6, %v1161_v17 }
 0x844   :  { %3079 = vmatmul.mubr.msk.bf16.vlgmr.msra.gmra.mrb[16].mxu1 %vm294_vm6, %v1162_v55 }
 0x917   :  { %v3080_v23 = vpop.f32.mrb[16].mxu1 }
 0x918   :  { %v1219_v47 = vpop.f32.mrb[17].mxu1  ;;  %v1235_v31 = vadd.f32 %v3080_v23, %v3591_v43  ;;  %v3277_v23 = vld [vmem:[#allocation2 + $0x68] sm:$0xff]  }
 0x919   :  { %v1233_v25 = vadd.f32 %v1219_v47, %v3596_v52  ;;  %v3081_v26 = vpop.f32.mrb[18].mxu1  ;;  %3090 = vmatprep.subr.bf16.mxu1 %v3277_v23  ;;  %v2814_v47 = vld [vmem:[#allocation5 + $0x3e] ss:$0 sm:$0xff] }
 0x91a   :  { %v1222_v30 = vpop.f32.mrb[19].mxu1  ;;  %v3904_v33 = vadd.f32 %v2811_v29, %v1235_v31  ;;  %3091 = vmatpush3.bf16.xpose.msra.mxu1 %v3277_v23 }
 0x91b   :  { %v3897_v32 = vadd.f32 %v2811_v29, %v1233_v25  ;;  %v1234_v1 = vadd.f32 %v1222_v30, %v3587_v40 }
 0x91c   :  { %v1252_v52 = vsel %vm294_vm6, %v3904_v33, 0.0 }
 0x91d   :  { %v3900_v11 = vadd.f32 %v2811_v29, %v1234_v1  ;;  %v1246_v8 = vsel %vm294_vm6, %v3897_v32, 0.0  ;;  %v3278_v29 = vld [vmem:[#allocation2 + $0x70] sm:$0xff]  }
 0x91e   :  { %1247 = vadd.xlane.f32.xlu1 %v1246_v8  ;;  %3092 = vmatprep.subr.bf16.mxu1 %v3278_v29 }
 0x91f   :  { %v1249_v34 = vsel %vm294_vm6, %v3900_v11, 0.0 }
 0x920   :  { %1250 = vadd.xlane.f32.xlu0 %v1249_v34 }
 0x922   :  { %3093 = vmatpush3.bf16.xpose.msra.mxu1 %v3278_v29 }
 0x924   :  { %1253 = vadd.xlane.f32.xlu0 %v1252_v52 }
 0x9ab   :  { %v1248_v43 = vpop.xlane.xlu1 %1247 }
 0x9ac   :  { %v1255_v37 = vmul.f32 0.03125, %v1248_v43 }
 0x9ad   :  { %v1251_v38 = vpop.xlane.xlu0 %1250 }
 0x9ae   :  { %v1258_v40 = vsub.f32 %v3897_v32, %v1255_v37  ;;  %v1256_v41 = vmul.f32 0.03125, %v1251_v38 }
 0x9b0   :  { %v1259_v20 = vsub.f32 %v3900_v11, %v1256_v41  ;;  %v1261_v42 = vmul.f32 %v1258_v40, %v1258_v40 }
 0x9b1   :  { %v1254_v44 = vpop.xlane.xlu0 %1253 }
 0x9b2   :  { %v1257_v3 = vmul.f32 0.03125, %v1254_v44  ;;  %v1264_v48 = vsel %vm294_vm6, %v1261_v42, 0.0  ;;  %v1262_v7 = vmul.f32 %v1259_v20, %v1259_v20 }
 0x9b3   :  { %1265 = vadd.xlane.f32.xlu1 %v1264_v48 }
 0x9b4   :  { %v1260_v51 = vsub.f32 %v3904_v33, %v1257_v3  ;;  %v1267_v10 = vsel %vm294_vm6, %v1262_v7, 0.0 }
 0x9b5   :  { %1268 = vadd.xlane.f32.xlu0 %v1267_v10 }
 0x9b6   :  { %v1263_v13 = vmul.f32 %v1260_v51, %v1260_v51 }
 0x9b8   :  { %v1270_v5 = vsel %vm294_vm6, %v1263_v13, 0.0 }
 0x9b9   :  { %1271 = vadd.xlane.f32.xlu1 %v1270_v5 }
 0xa40   :  { %v1266_v46 = vpop.xlane.xlu1 %1265 }
 0xa41   :  { %v1273_v18 = vmul.f32 0.03125, %v1266_v46 }
 0xa42   :  { %v1269_v59 = vpop.xlane.xlu0 %1268 }
 0xa43   :  { %v1276_v62 = vadd.f32 1e-05, %v1273_v18  ;;  %v1274_v63 = vmul.f32 0.03125, %v1269_v59 }
 0xa45   :  { %3345 = vrsqrt.f32 %v1276_v62  ;;  %v1277_v56 = vadd.f32 1e-05, %v1274_v63 }
 0xa46   :  { %v1272_v53 = vpop.xlane.xlu1 %1271 }
 0xa47   :  { %3347 = vrsqrt.f32 %v1277_v56  ;;  %v1275_v6 = vmul.f32 0.03125, %v1272_v53 }
 0xa49   :  { %v1278_v61 = vadd.f32 1e-05, %v1275_v6 }
 0xa4b   :  { %3349 = vrsqrt.f32 %v1278_v61 }
 0xa4f   :  { %v3346_v0 = vpop.eup %3345 }
 0xa50   :  { %v1282_v12 = vmul.f32 %v3346_v0, %v1258_v40 }
 0xa51   :  { %v3348_v54 = vpop.eup %3347 }
 0xa52   :  { %v1283_v28 = vmul.f32 %v3348_v54, %v1259_v20  ;;  %v1289_v19 = vmul.f32 %v2812_v9, %v1282_v12  ;;  %v2821_v54 = vld [vmem:[#allocation5 + $0x3f] ss:$0 sm:$0xff] }
 0xa54   :  { %v1290_v4 = vmul.f32 %v2812_v9, %v1283_v28  ;;  %v1296_v14 = vadd.f32 %v2813_v60, %v1289_v19 }
 0xa55   :  { %v3350_v21 = vpop.eup %3349 }
 0xa56   :  { %v1284_v39 = vmul.f32 %v3350_v21, %v1260_v51  ;;  %v1297_v15 = vadd.f32 %v2813_v60, %v1290_v4 }
 0xa58   :  { %v1299_v22 = vpack.c.bf16 %v1297_v15, %v1296_v14  ;;  %v1291_v50 = vmul.f32 %v2812_v9, %v1284_v39 }
 0xa5a   :  { %3086 = vmatprep.mubr.msk.bf16.mxu0 %vm294_vm6, %v1299_v22  ;;  %v1298_v17 = vadd.f32 %v2813_v60, %v1291_v50 }
 0xa5c   :  { %v1300_v55 = vpack.c.bf16 %v1298_v17, %v1298_v17 }
 0xa5e   :  { %3087 = vmatmul.mubr.msk.bf16.vlgmr.msra.gmra.mrb[20].mxu0 %vm294_vm6, %v1300_v55 }
 0xb31   :  { %v3088_v25 = vpop.f32.mrb[20].mxu0 }
 0xb32   :  { %v1371_v26 = vadd.f32 %v3088_v25, %v2814_v47  ;;  %v1362_v30 = vpop.f32.mrb[21].mxu0 }
 0xb33   :  { %v1363_v31 = vadd.f32 %v2814_v47, %v1362_v30  ;;  %v3089_v1 = vpop.f32.mrb[22].mxu0 }
 0xb34   :  { %v1381_v8 = vmul.f32 %v1371_v26, %v1371_v26  ;;  %v1365_v34 = vpop.f32.mrb[23].mxu0  ;;  %v1378_v59 = vmul.f32 0.5, %v1371_v26 }
 0xb35   :  { %v1379_v52 = vmul.f32 %v1363_v31, %v1363_v31  ;;  %v1366_v43 = vadd.f32 %v2814_v47, %v1365_v34  ;;  %v1376_v62 = vmul.f32 0.5, %v1363_v31 }
 0xb36   :  { %v1384_v37 = vmul.f32 %v1381_v8, %v1371_v26 }
 0xb37   :  { %v1382_v38 = vmul.f32 %v1379_v52, %v1363_v31  ;;  %v1380_v40 = vmul.f32 %v1366_v43, %v1366_v43  ;;  %v1377_v63 = vmul.f32 0.5, %v1366_v43 }
 0xb38   :  { %v1387_v41 = vmul.f32 0.044715, %v1384_v37  ;;  %v3279_v37 = vld [vmem:[#allocation2 + $0x78] sm:$0xff]  }
 0xb39   :  { %v1385_v20 = vmul.f32 0.044715, %v1382_v38  ;;  %v1383_v42 = vmul.f32 %v1380_v40, %v1366_v43  ;;  %v3280_v38 = vld [vmem:[#allocation2 + $0x80] sm:$0xff]   ;;  %3098 = vmatprep.subr.bf16.mxu0 %v3279_v37 }
 0xb3a   :  { %v1390_v44 = vadd.f32 %v1387_v41, %v1371_v26  ;;  %3099 = vmatpush3.bf16.msra.mxu0 %v3279_v37 }
 0xb3b   :  { %v1388_v3 = vadd.f32 %v1385_v20, %v1363_v31  ;;  %v1386_v48 = vmul.f32 0.044715, %v1383_v42  ;;  %3100 = vmatprep.subr.bf16.mxu0 %v3280_v38 }
 0xb3c   :  { %v1393_v7 = vmul.f32 0.7978846, %v1390_v44 }
 0xb3d   :  { %v1391_v51 = vmul.f32 0.7978846, %v1388_v3  ;;  %v1389_v10 = vadd.f32 %v1386_v48, %v1366_v43 }
 0xb3e   :  { %3351 = vtanh.f32 %v1393_v7  ;;  %3101 = vmatpush3.bf16.msra.mxu0 %v3280_v38 }
 0xb3f   :  { %3353 = vtanh.f32 %v1391_v51  ;;  %v1392_v13 = vmul.f32 0.7978846, %v1389_v10 }
 0xb41   :  { %3355 = vtanh.f32 %v1392_v13  ;;  %v2822_v13 = vld [vmem:[#allocation5 + $0x40] ss:$0 sm:$0xff] }
 0xb48   :  { %v3352_v5 = vpop.eup %3351 }
 0xb49   :  { %v3354_v57 = vpop.eup %3353  ;;  %v1399_v27 = vadd.f32 1.0, %v3352_v5 }
 0xb4a   :  { %v1397_v46 = vadd.f32 1.0, %v3354_v57 }
 0xb4b   :  { %v3356_v18 = vpop.eup %3355  ;;  %v1402_v53 = vmul.f32 %v1399_v27, %v1378_v59  ;;  %v2823_v59 = vld [vmem:[#allocation5 + $0x41] ss:$0 sm:$0xff] }
 0xb4c   :  { %v1398_v56 = vadd.f32 1.0, %v3356_v18  ;;  %v1400_v6 = vmul.f32 %v1397_v46, %v1376_v62 }
 0xb4d   :  { %v1404_v9 = vpack.c.bf16 %v1402_v53, %v1402_v53 }
 0xb4e   :  { %v1401_v61 = vmul.f32 %v1398_v56, %v1377_v63 }
 0xb50   :  { %v1403_v0 = vpack.c.bf16 %v1401_v61, %v1400_v6 }
 0xb52   :  { %3094 = vmatprep.mubr.bf16.mxu1 %v1403_v0 }
 0xb53   :  { %3095 = vmatmul.mubr.bf16.vlgmr.msra.gmra.mrb[20].mxu1 %v1404_v9 }
 0xc26   :  { %v3096_v12 = vpop.f32.mrb[20].mxu1 }
 0xc27   :  { %v1455_v28 = vpop.f32.mrb[21].mxu1  ;;  %v1471_v19 = vadd.f32 %v3096_v12, %v3904_v33  ;;  %v2824_v12 = vld [vmem:[#allocation5 + $0x42] ss:$0 sm:$0xff] }
 0xc28   :  { %v1469_v60 = vadd.f32 %v1455_v28, %v3897_v32  ;;  %v3097_v4 = vpop.f32.mrb[22].mxu1 }
 0xc29   :  { %v1458_v21 = vpop.f32.mrb[23].mxu1  ;;  %v3923_v15 = vadd.f32 %v2821_v54, %v1471_v19 }
 0xc2a   :  { %v3920_v39 = vadd.f32 %v2821_v54, %v1469_v60  ;;  %v1470_v14 = vadd.f32 %v1458_v21, %v3900_v11 }
 0xc2b   :  { %v1488_v32 = vsel %vm294_vm6, %v3923_v15, 0.0 }
 0xc2c   :  { %v3925_v22 = vadd.f32 %v2821_v54, %v1470_v14  ;;  %v1482_v50 = vsel %vm294_vm6, %v3920_v39, 0.0 }
 0xc2d   :  { %1483 = vadd.xlane.f32.xlu0 %v1482_v50 }
 0xc2e   :  { %v1485_v17 = vsel %vm294_vm6, %v3925_v22, 0.0 }
 0xc2f   :  { %1486 = vadd.xlane.f32.xlu1 %v1485_v17 }
 0xc31   :  { %1489 = vadd.xlane.f32.xlu0 %v1488_v32 }
 0xcba   :  { %v1484_v33 = vpop.xlane.xlu0 %1483 }
 0xcbb   :  { %v1491_v55 = vmul.f32 0.03125, %v1484_v33 }
 0xcbc   :  { %v1487_v23 = vpop.xlane.xlu1 %1486 }
 0xcbd   :  { %v1494_v11 = vsub.f32 %v3920_v39, %v1491_v55  ;;  %v1492_v29 = vmul.f32 0.03125, %v1487_v23 }
 0xcbe   :  { %v1490_v47 = vpop.xlane.xlu0 %1489 }
 0xcbf   :  { %v1495_v25 = vsub.f32 %v3925_v22, %v1492_v29  ;;  %v1493_v26 = vmul.f32 0.03125, %v1490_v47  ;;  %v1497_v30 = vmul.f32 %v1494_v11, %v1494_v11 }
 0xcc1   :  { %v1496_v31 = vsub.f32 %v3923_v15, %v1493_v26  ;;  %v1500_v1 = vsel %vm294_vm6, %v1497_v30, 0.0  ;;  %v1498_v8 = vmul.f32 %v1495_v25, %v1495_v25 }
 0xcc2   :  { %1501 = vadd.xlane.f32.xlu1 %v1500_v1 }
 0xcc3   :  { %v1503_v34 = vsel %vm294_vm6, %v1498_v8, 0.0  ;;  %v1499_v52 = vmul.f32 %v1496_v31, %v1496_v31 }
 0xcc4   :  { %1504 = vadd.xlane.f32.xlu0 %v1503_v34 }
 0xcc5   :  { %v1506_v43 = vsel %vm294_vm6, %v1499_v52, 0.0 }
 0xcc6   :  { %1507 = vadd.xlane.f32.xlu1 %v1506_v43 }
 0xd4f   :  { %v1502_v40 = vpop.xlane.xlu1 %1501 }
 0xd50   :  { %v1509_v41 = vmul.f32 0.03125, %v1502_v40 }
 0xd51   :  { %v1505_v20 = vpop.xlane.xlu0 %1504 }
 0xd52   :  { %v1512_v42 = vadd.f32 1e-05, %v1509_v41  ;;  %v1510_v44 = vmul.f32 0.03125, %v1505_v20 }
 0xd53   :  { %v1508_v3 = vpop.xlane.xlu1 %1507 }
 0xd54   :  { %3357 = vrsqrt.f32 %v1512_v42  ;;  %v1513_v48 = vadd.f32 1e-05, %v1510_v44  ;;  %v1511_v7 = vmul.f32 0.03125, %v1508_v3 }
 0xd56   :  { %3359 = vrsqrt.f32 %v1513_v48  ;;  %v1514_v51 = vadd.f32 1e-05, %v1511_v7 }
 0xd58   :  { %3361 = vrsqrt.f32 %v1514_v51 }
 0xd5e   :  { %v3358_v10 = vpop.eup %3357 }
 0xd5f   :  { %v1518_v5 = vmul.f32 %v3358_v10, %v1494_v11 }
 0xd60   :  { %v3360_v57 = vpop.eup %3359 }
 0xd61   :  { %v1519_v27 = vmul.f32 %v3360_v57, %v1495_v25  ;;  %v1525_v46 = vmul.f32 %v2822_v13, %v1518_v5 }
 0xd62   :  { %v3362_v18 = vpop.eup %3361 }
 0xd63   :  { %v1520_v62 = vmul.f32 %v3362_v18, %v1496_v31  ;;  %v1526_v63 = vmul.f32 %v2822_v13, %v1519_v27  ;;  %v1532_v56 = vadd.f32 %v2823_v59, %v1525_v46 }
 0xd65   :  { %v1533_v53 = vadd.f32 %v2823_v59, %v1526_v63  ;;  %v1527_v6 = vmul.f32 %v2822_v13, %v1520_v62 }
 0xd67   :  { %v1535_v61 = vpack.c.bf16 %v1533_v53, %v1532_v56  ;;  %v1534_v0 = vadd.f32 %v2823_v59, %v1527_v6 }
 0xd69   :  { %3102 = vmatprep.mubr.msk.bf16.mxu0 %vm294_vm6, %v1535_v61  ;;  %v1536_v9 = vpack.c.bf16 %v1534_v0, %v1534_v0 }
 0xd6b   :  { %3103 = vmatmul.mubr.msk.bf16.vlgmr.msra.gmra.mrb[24].mxu0 %vm294_vm6, %v1536_v9 }
 0xe3e   :  { %v3104_v54 = vpop.f32.mrb[24].mxu0 }
 0xe3f   :  { %v3941_v28 = vadd.f32 %v3104_v54, %v2824_v12  ;;  %v1598_v19 = vpop.f32.mrb[25].mxu0 }
 0xe40   :  { %v1599_v60 = vadd.f32 %v2824_v12, %v1598_v19  ;;  %v3105_v4 = vpop.f32.mrb[26].mxu0 }
 0xe41   :  { %v1601_v21 = vpop.f32.mrb[27].mxu0  ;;  %v1727_v14 = vmul.f32 %v3941_v28, %v3629_v49  ;;  %v1616_v17 = vmul.f32 %v3941_v28, %v3625_v45  ;;  %v1960_v38 = vmul.f32 %v3941_v28, %v3639_v58  ;;  %v2132_v51 = vmul.f32 %v3941_v28, %v3658_v2 }
 0xe42   :  { %v1602_v50 = vadd.f32 %v2824_v12, %v1601_v21  ;;  %v1725_v33 = vmul.f32 %v1599_v60, %v3629_v49  ;;  %v1614_v55 = vmul.f32 %v1599_v60, %v3625_v45  ;;  %v1958_v23 = vmul.f32 %v1599_v60, %v3639_v58 }
 0xe43   :  { %v1729_v32 = vpack.c.bf16 %v1727_v14, %v1727_v14  ;;  %v2130_v26 = vmul.f32 %v1599_v60, %v3658_v2  ;;  %v1825_v31 = vmul.f32 %v1599_v60, %v3695_v24  ;;  %v3966_v43 = vmul.f32 %v1599_v60, %v3760_v16 }
 0xe44   :  { %v3950_v11 = vpack.c.bf16 %v1602_v50, %v1599_v60  ;;  %v1726_v29 = vmul.f32 %v1602_v50, %v3629_v49  ;;  %v1615_v47 = vmul.f32 %v1602_v50, %v3625_v45  ;;  %v1959_v25 = vmul.f32 %v1602_v50, %v3639_v58 }
 0xe45   :  { %1734 = vrot.lane.b32.xlu1 %v1729_v32, %s3514_s0  ;;  %v2131_v30 = vmul.f32 %v1602_v50, %v3658_v2  ;;  %v1826_v1 = vmul.f32 %v1602_v50, %v3695_v24  ;;  %v3969_v37 = vmul.f32 %v1602_v50, %v3760_v16  ;;  %v3975_v40 = vmul.f32 %v1599_v60, %v3783_v36 }
 0xe46   :  { %3110 = vmatprep.mubr.msk.bf16.mxu0 %vm294_vm6, %v3950_v11  ;;  %3118 = vmatprep.mubr.msk.bf16.mxu1 %vm294_vm6, %v3950_v11  ;;  %v1728_v49 = vpack.c.bf16 %v1726_v29, %v1725_v33  ;;  %v1617_v45 = vpack.c.bf16 %v1615_v47, %v1614_v55  ;;  %v1961_v8 = vpack.c.bf16 %v1959_v25, %v1958_v23  ;;  %v3431_v47 = vld [vmem:[#allocation5 + $0x8] sm:$0xff] }
 0xe47   :  { %v2133_v34 = vpack.c.bf16 %v2131_v30, %v2130_v26  ;;  %v1828_v52 = vpack.c.bf16 %v1826_v1, %v1825_v31  ;;  %v3978_v41 = vmul.f32 %v1602_v50, %v3783_v36  ;;  %v1618_v20 = vpack.c.bf16 %v1616_v17, %v1616_v17 }
 0xe48   :  { %1732 = vrot.lane.b32.xlu0 %v1728_v49, %s3514_s0  ;;  %v1723_v42 = vpack.c.bf16 %v3969_v37, %v3966_v43  ;;  %v3983_v44 = vmul.f32 %v1599_v60, %v3720_v35  ;;  %v3986_v3 = vmul.f32 %v1602_v50, %v3720_v35  ;;  %v1962_v7 = vpack.c.bf16 %v1960_v38, %v1960_v38  ;;  %v3429_v60 = vld [vmem:[#allocation5 + $0x10] sm:$0xff] }
 0xe49   :  { %1621 = vrot.lane.b32.xlu1 %v1617_v45, %s3514_s0  ;;  %v2061_v48 = vpack.c.bf16 %v3978_v41, %v3975_v40  ;;  %v2134_v10 = vpack.c.bf16 %v2132_v51, %v2132_v51  ;;  %v1613_v53 = vpack.c.bf16 %v3941_v28, %v3941_v28  ;;  %v1722_v43 = vmul.f32 %v3941_v28, %v3760_v16 }
 0xe4a   :  { %v2233_v58 = vpack.c.bf16 %v3986_v3, %v3983_v44 }
 0xe4b   :  { %v1724_v37 = vpack.c.bf16 %v1722_v43, %v1722_v43 }
 0xe4c   :  { %1623 = vrot.lane.b32.xlu0 %v1618_v20, %s3514_s0 }
 0xe4d   :  { %1965 = vrot.lane.b32.xlu1 %v1961_v8, %s3514_s0 }
 0xe50   :  { %1967 = vrot.lane.b32.xlu0 %v1962_v7, %s3514_s0 }
 0xe51   :  { %2137 = vrot.lane.b32.xlu1 %v2133_v34, %s3514_s0 }
 0xe54   :  { %2139 = vrot.lane.b32.xlu0 %v2134_v10, %s3514_s0 }
 0xe58   :  { %1832 = vrot.lane.b32.xlu0 %v1828_v52, %s3505_s25 }
 0xeb7   :  { %v1735_v13 = vpop.permute.xlu1 %1734 }
 0xeb8   :  { %v1740_v59 = vsel %vm294_vm6, %v1735_v13, 0 }
 0xeba   :  { %v1733_v5 = vpop.permute.xlu0 %1732 }
 0xebb   :  { %v1737_v57 = vsel %vm294_vm6, %v1733_v5, 0  ;;  %3240 = vmatprep.subr.msk.bf16.mxu1 %vm294_vm6, %v1733_v5  ;;  %v1622_v27 = vpop.permute.xlu1 %1621 }
 0xebc   :  { %v1632_v46 = vsel %vm294_vm6, %v1622_v27, 0  ;;  %3238 = vmatprep.subr.msk.bf16.mxu0 %vm294_vm6, %v1622_v27  ;;  %3115 = vmatpush3.bf16.xpose.msra.mxu1 %v1737_v57 }
 0xebd   :  { %3107 = vmatpush3.bf16.xpose.msra.mxu0 %v1632_v46  ;;  %3241 = vmatprep.subr.msk.bf16.mxu1 %vm294_vm6, %v1735_v13 }
 0xebe   :  { %v1624_v2 = vpop.permute.xlu0 %1623 }
 0xebf   :  { %3239 = vmatprep.subr.msk.bf16.mxu0 %vm294_vm6, %v1624_v2  ;;  %v1635_v62 = vsel %vm294_vm6, %v1624_v2, 0  ;;  %v1966_v63 = vpop.permute.xlu1 %1965 }
 0xec0   :  { %v1970_v61 = vsel %vm294_vm6, %v1966_v63, 0 }
 0xec2   :  { %v1968_v18 = vpop.permute.xlu0 %1967 }
 0xec3   :  { %v1973_v0 = vsel %vm294_vm6, %v1968_v18, 0  ;;  %v2138_v9 = vpop.permute.xlu1 %2137 }
 0xec4   :  { %3117 = vmatpush3.bf16.xpose.msra.mxu1 %v1740_v59  ;;  %v2142_v12 = vsel %vm294_vm6, %v2138_v9, 0  ;;  %v1827_v59 = vmul.f32 %v3941_v28, %v3695_v24 }
 0xec5   :  { %3109 = vmatpush3.bf16.xpose.msra.mxu0 %v1635_v62  ;;  %3244 = vmatprep.subr.msk.bf16.mxu1 %vm294_vm6, %v1966_v63 }
 0xec6   :  { %v2140_v56 = vpop.permute.xlu0 %2139  ;;  %v1829_v63 = vpack.c.bf16 %v1827_v59, %v1827_v59 }
 0xec7   :  { %v2145_v54 = vsel %vm294_vm6, %v2140_v56, 0 }
 0xeca   :  { %v1833_v6 = vpop.permute.xlu0 %1832 }
 0xecb   :  { %3119 = vmatmul.mubr.msk.bf16.vlgmr.msra.gmra.mrb[24].mxu1 %vm294_vm6, %v1613_v53  ;;  %3122 = vmatprep.subr.bf16.mxu0 %v1833_v6 }
 0xecc   :  { %3111 = vmatmul.mubr.msk.bf16.vlgmr.msra.gmra.mrb[28].mxu0 %vm294_vm6, %v1613_v53  ;;  %3139 = vmatpush3.bf16.xpose.msra.mxu1 %v1970_v61 }
 0xecd   :  { %3142 = vmatprep.mubr.msk.bf16.mxu1 %vm294_vm6, %v3950_v11  ;;  %3123 = vmatpush3.bf16.msra.mxu0 %v1833_v6 }
 0xece   :  { %3245 = vmatprep.subr.msk.bf16.mxu1 %vm294_vm6, %v1968_v18 }
 0xed4   :  { %3141 = vmatpush3.bf16.xpose.msra.mxu1 %v1973_v0 }
 0xed5   :  { %3247 = vmatprep.subr.msk.bf16.mxu1 %vm294_vm6, %v2138_v9 }
 0xedb   :  { %3143 = vmatmul.mubr.msk.bf16.vlgmr.msra.gmra.mrb[28].mxu1 %vm294_vm6, %v1613_v53 }
 0xedc   :  { %3155 = vmatpush3.bf16.xpose.msra.mxu1 %v2142_v12  ;;  %3158 = vmatprep.mubr.msk.bf16.mxu1 %vm294_vm6, %v3950_v11  ;;  %v3430_v11 = vld [vmem:[#allocation5] sm:$0xff] }
 0xedd   :  { %3248 = vmatprep.subr.msk.bf16.mxu1 %vm294_vm6, %v2140_v56 }
 0xee4   :  { %3157 = vmatpush3.bf16.xpose.msra.mxu1 %v2145_v54 }
 0xeeb   :  { %3159 = vmatmul.mubr.msk.bf16.vlgmr.msra.gmra.mrb[32].mxu1 %vm294_vm6, %v1613_v53 }
 0xf9e   :  { %v3120_v19 = vpop.f32.mrb[24].mxu1 }
 0xf9f   :  { %v4026_v4 = vadd.f32 %v3429_v60, %v3120_v19  ;;  %v3112_v21 = vpop.f32.mrb[28].mxu0  ;;  %v1776_v14 = vpop.f32.mrb[25].mxu1 }
 0xfa0   :  { %v1680_v50 = vadd.f32 %v3429_v60, %v3112_v21  ;;  %v1671_v17 = vpop.f32.mrb[29].mxu0  ;;  %v3121_v32 = vpop.f32.mrb[26].mxu1  ;;  %v1777_v29 = vadd.f32 %v3430_v11, %v1776_v14 }
 0xfa1   :  { %v3113_v33 = vpop.f32.mrb[30].mxu0  ;;  %v1779_v55 = vpop.f32.mrb[27].mxu1  ;;  %v1796_v23 = vsel %vm507_vm10, %v4026_v4, -inf  ;;  %v1672_v49 = vadd.f32 %v3430_v11, %v1671_v17 }
 0xfa2   :  { %v4030_v25 = vadd.f32 %v3431_v47, %v1779_v55  ;;  %1797 = vmax.xlane.f32.xlu0 %v1796_v23  ;;  %v1674_v26 = vpop.f32.mrb[31].mxu0  ;;  %v1691_v30 = vsel %vm507_vm10, %v1680_v50, -inf  ;;  %v1790_v45 = vsel %vm507_vm10, %v1777_v29, -inf }
 0xfa3   :  { %1692 = vmax.xlane.f32.xlu1 %v1691_v30  ;;  %v1675_v1 = vadd.f32 %v3431_v47, %v1674_v26  ;;  %v1685_v34 = vsel %vm507_vm10, %v1672_v49, -inf }
 0xfa4   :  { %v1793_v31 = vsel %vm507_vm10, %v4030_v25, -inf }
 0xfa5   :  { %v1688_v8 = vsel %vm507_vm10, %v1675_v1, -inf }
 0xfa6   :  { %1794 = vmax.xlane.f32.xlu0 %v1793_v31 }
 0xfa7   :  { %1791 = vmax.xlane.f32.xlu1 %v1790_v45 }
 0xfaa   :  { %1689 = vmax.xlane.f32.xlu0 %v1688_v8 }
 0xfab   :  { %1686 = vmax.xlane.f32.xlu1 %v1685_v34 }
 0xfae   :  { %v3144_v52 = vpop.f32.mrb[28].mxu1 }
 0xfaf   :  { %v4038_v38 = vadd.f32 %v3429_v60, %v3144_v52  ;;  %v2009_v20 = vpop.f32.mrb[29].mxu1 }
 0xfb0   :  { %v3145_v7 = vpop.f32.mrb[30].mxu1  ;;  %v4040_v51 = vadd.f32 %v3430_v11, %v2009_v20 }
 0xfb1   :  { %v2012_v10 = vpop.f32.mrb[31].mxu1  ;;  %v2029_v13 = vsel %vm507_vm10, %v4038_v38, -inf }
 0xfb2   :  { %v4044_v5 = vadd.f32 %v3431_v47, %v2012_v10  ;;  %2030 = vmax.xlane.f32.xlu0 %v2029_v13  ;;  %v2023_v27 = vsel %vm507_vm10, %v4040_v51, -inf }
 0xfb4   :  { %v2026_v57 = vsel %vm507_vm10, %v4044_v5, -inf }
 0xfb5   :  { %2027 = vmax.xlane.f32.xlu1 %v2026_v57 }
 0xfb6   :  { %2024 = vmax.xlane.f32.xlu0 %v2023_v27 }
 0xfbe   :  { %v3160_v46 = vpop.f32.mrb[32].mxu1 }
 0xfbf   :  { %v2181_v2 = vpop.f32.mrb[33].mxu1  ;;  %v4057_v56 = vadd.f32 %v3429_v60, %v3160_v46 }
 0xfc0   :  { %v3161_v18 = vpop.f32.mrb[34].mxu1  ;;  %v4061_v6 = vadd.f32 %v3430_v11, %v2181_v2  ;;  %v2060_v2 = vmul.f32 %v3941_v28, %v3783_v36 }
 0xfc1   :  { %v2184_v62 = vpop.f32.mrb[35].mxu1  ;;  %v2201_v61 = vsel %vm507_vm10, %v4057_v56, -inf }
 0xfc2   :  { %v4059_v53 = vadd.f32 %v3431_v47, %v2184_v62  ;;  %v2195_v0 = vsel %vm507_vm10, %v4061_v6, -inf  ;;  %v2062_v18 = vpack.c.bf16 %v2060_v2, %v2060_v2 }
 0xfc4   :  { %v2198_v24 = vsel %vm507_vm10, %v4059_v53, -inf }
 0xfc6   :  { %1834 = vrot.lane.b32.xlu1 %v1829_v63, %s3505_s25 }
 0xfcc   :  { %1896 = vrot.lane.b32.xlu0 %v1723_v42, %s3505_s25 }
 0xfea   :  { %2202 = vmax.xlane.f32.xlu1 %v2201_v61 }
 0xfeb   :  { %2199 = vmax.xlane.f32.xlu0 %v2198_v24 }
 0xfee   :  { %2196 = vmax.xlane.f32.xlu1 %v2195_v0 }
0x1001   :  { %1898 = vrot.lane.b32.xlu0 %v1724_v37, %s3505_s25 }
0x102f   :  { %v1798_v42 = vpop.xlane.xlu0 %1797 }
0x1030   :  { %v1801_v9 = vsub.f32 %v4026_v4, %v1798_v42  ;;  %v1693_v12 = vpop.xlane.xlu1 %1692 }
0x1031   :  { %v1696_v54 = vsub.f32 %v1680_v50, %v1693_v12 }
0x1032   :  { %v1806_v19 = vmul.f32 1.442695, %v1801_v9 }
0x1033   :  { %v1701_v60 = vmul.f32 1.442695, %v1696_v54  ;;  %v1795_v21 = vpop.xlane.xlu0 %1794 }
0x1034   :  { %3363 = vpow2.f32 %v1806_v19  ;;  %v1792_v14 = vpop.xlane.xlu1 %1791  ;;  %v1800_v32 = vsub.f32 %v4030_v25, %v1795_v21 }
0x1035   :  { %3365 = vpow2.f32 %v1701_v60  ;;  %v1799_v17 = vsub.f32 %v1777_v29, %v1792_v14 }
0x1036   :  { %v1804_v26 = vmul.f32 1.442695, %v1800_v32  ;;  %v2232_v32 = vmul.f32 %v3941_v28, %v3720_v35 }
0x1037   :  { %v1802_v33 = vmul.f32 1.442695, %v1799_v17  ;;  %v1690_v55 = vpop.xlane.xlu0 %1689 }
0x1038   :  { %v1695_v16 = vsub.f32 %v1675_v1, %v1690_v55  ;;  %v1687_v23 = vpop.xlane.xlu1 %1686 }
0x1039   :  { %3367 = vpow2.f32 %v1802_v33  ;;  %v1694_v11 = vsub.f32 %v1672_v49, %v1687_v23  ;;  %v2234_v33 = vpack.c.bf16 %v2232_v32, %v2232_v32 }
0x103a   :  { %v1699_v47 = vmul.f32 1.442695, %v1695_v16 }
0x103b   :  { %v1697_v4 = vmul.f32 1.442695, %v1694_v11 }
0x103c   :  { %3369 = vpow2.f32 %v1699_v47 }
0x103d   :  { %3371 = vpow2.f32 %v1697_v4 }
0x103e   :  { %v4074_v50 = vpop.eup %3363  ;;  %3373 = vpow2.f32 %v1804_v26 }
0x103f   :  { %v4076_v30 = vpop.eup %3365  ;;  %v2031_v31 = vpop.xlane.xlu0 %2030  ;;  %v1814_v29 = vsel %vm507_vm10, %v4074_v50, 0.0 }
0x1040   :  { %1815 = vadd.xlane.f32.xlu0 %v1814_v29  ;;  %v1709_v25 = vsel %vm507_vm10, %v4076_v30, 0.0  ;;  %v2034_v59 = vsub.f32 %v4038_v38, %v2031_v31 }
0x1041   :  { %1710 = vadd.xlane.f32.xlu1 %v1709_v25 }
0x1042   :  { %v2028_v1 = vpop.xlane.xlu1 %2027  ;;  %v2039_v62 = vmul.f32 1.442695, %v2034_v59 }
0x1043   :  { %v4082_v49 = vpop.eup %3367  ;;  %v2025_v45 = vpop.xlane.xlu0 %2024  ;;  %v2033_v61 = vsub.f32 %v4044_v5, %v2028_v1 }
0x1044   :  { %v1808_v8 = vsel %vm507_vm10, %v4082_v49, 0.0  ;;  %v2032_v63 = vsub.f32 %v4040_v51, %v2025_v45  ;;  %3375 = vpow2.f32 %v2039_v62 }
0x1045   :  { %1809 = vadd.xlane.f32.xlu0 %v1808_v8  ;;  %v2037_v0 = vmul.f32 1.442695, %v2033_v61 }
0x1046   :  { %v4086_v34 = vpop.eup %3369  ;;  %v1835_v52 = vpop.permute.xlu1 %1834  ;;  %v2035_v24 = vmul.f32 1.442695, %v2032_v63 }
0x1047   :  { %v4088_v20 = vpop.eup %3371  ;;  %v1844_v7 = vsel %vm278_vm8, %v1835_v52, 0  ;;  %v4091_v10 = vpop.permute.xlu0 %1896  ;;  %3242 = vmatprep.subr.msk.bf16.mxu0 %vm278_vm8, %v1835_v52  ;;  %v1706_v13 = vsel %vm507_vm10, %v4086_v34, 0.0 }
0x1048   :  { %3125 = vmatpush3.bf16.msra.mxu0 %v1844_v7  ;;  %v1703_v57 = vsel %vm507_vm10, %v4088_v20, 0.0  ;;  %v4098_v27 = vpop.eup %3373  ;;  %3377 = vpow2.f32 %v2035_v24 }
0x1049   :  { %1707 = vadd.xlane.f32.xlu0 %v1706_v13  ;;  %1704 = vadd.xlane.f32.xlu1 %v1703_v57  ;;  %v1811_v46 = vsel %vm507_vm10, %v4098_v27, 0.0  ;;  %3379 = vpow2.f32 %v2037_v0 }
0x104a   :  { %3130 = vmatprep.subr.bf16.mxu0 %v4091_v10 }
0x104d   :  { %1812 = vadd.xlane.f32.xlu1 %v1811_v46 }
0x104e   :  { %v4116_v51 = vpop.eup %3375 }
0x104f   :  { %v2047_v9 = vsel %vm507_vm10, %v4116_v51, 0.0 }
0x1052   :  { %v4120_v12 = vpop.eup %3377 }
0x105e   :  { %2065 = vrot.lane.b32.xlu1 %v2061_v48, %s3505_s25 }
0x105f   :  { %2067 = vrot.lane.b32.xlu0 %v2062_v18, %s3505_s25 }
0x1077   :  { %v2203_v43 = vpop.xlane.xlu1 %2202 }
0x1078   :  { %v2206_v36 = vsub.f32 %v4057_v56, %v2203_v43  ;;  %v2200_v37 = vpop.xlane.xlu0 %2199  ;;  %v4122_v56 = vpop.eup %3379 }
0x1079   :  { %v2205_v40 = vsub.f32 %v4059_v53, %v2200_v37  ;;  %v2041_v53 = vsel %vm507_vm10, %v4120_v12, 0.0  ;;  %v2044_v60 = vsel %vm507_vm10, %v4122_v56, 0.0 }
0x107a   :  { %v2211_v41 = vmul.f32 1.442695, %v2206_v36 }
0x107b   :  { %v2209_v48 = vmul.f32 1.442695, %v2205_v40  ;;  %v2197_v42 = vpop.xlane.xlu1 %2196 }
0x107c   :  { %3381 = vpow2.f32 %v2211_v41  ;;  %v2204_v38 = vsub.f32 %v4061_v6, %v2197_v42  ;;  %v1899_v55 = vpop.permute.xlu0 %1898 }
0x107d   :  { %3383 = vpow2.f32 %v2209_v48 }
0x107e   :  { %v2207_v5 = vmul.f32 1.442695, %v2204_v38 }
0x1080   :  { %3385 = vpow2.f32 %v2207_v5 }
0x1082   :  { %2048 = vadd.xlane.f32.xlu1 %v2047_v9 }
0x1086   :  { %v4126_v54 = vpop.eup %3381  ;;  %2042 = vadd.xlane.f32.xlu1 %v2041_v53 }
0x1087   :  { %v2219_v6 = vsel %vm507_vm10, %v4126_v54, 0.0  ;;  %v4130_v19 = vpop.eup %3383 }
0x1088   :  { %2220 = vadd.xlane.f32.xlu0 %v2219_v6  ;;  %v2216_v17 = vsel %vm507_vm10, %v4130_v19, 0.0 }
0x108a   :  { %v4134_v21 = vpop.eup %3385  ;;  %2045 = vadd.xlane.f32.xlu1 %v2044_v60 }
0x108b   :  { %v2213_v14 = vsel %vm507_vm10, %v4134_v21, 0.0 }
0x108c   :  { %2214 = vadd.xlane.f32.xlu0 %v2213_v14 }
0x108e   :  { %2217 = vadd.xlane.f32.xlu1 %v2216_v17 }
0x109f   :  { %2237 = vrot.lane.b32.xlu1 %v2233_v58, %s3505_s25 }
0x10a2   :  { %2239 = vrot.lane.b32.xlu0 %v2234_v33, %s3505_s25 }
0x10cd   :  { %v1816_v16 = vpop.xlane.xlu0 %1815 }
0x10ce   :  { %v1711_v23 = vpop.xlane.xlu1 %1710  ;;  %3387 = vrcp.f32 %v1816_v16 }
0x10d2   :  { %v1810_v11 = vpop.xlane.xlu0 %1809 }
0x10d3   :  { %3389 = vrcp.f32 %v1810_v11 }
0x10d6   :  { %v1708_v47 = vpop.xlane.xlu0 %1707  ;;  %v1705_v26 = vpop.xlane.xlu1 %1704 }
0x10d7   :  { %3391 = vrcp.f32 %v1708_v47 }
0x10d8   :  { %3393 = vrcp.f32 %v1705_v26  ;;  %v3388_v35 = vpop.eup %3387 }
0x10d9   :  { %v1822_v58 = vmul.f32 %v3388_v35, %v4074_v50 }
0x10da   :  { %v1813_v4 = vpop.xlane.xlu1 %1812  ;;  %v2068_v57 = vpop.permute.xlu0 %2067 }
0x10db   :  { %3395 = vrcp.f32 %v1813_v4  ;;  %v1824_v52 = vpack.c.bf16 %v1822_v58, %v1822_v58 }
0x10dc   :  { %3397 = vrcp.f32 %v1711_v23 }
0x10dd   :  { %v3390_v28 = vpop.eup %3389 }
0x10de   :  { %v1820_v29 = vmul.f32 %v3390_v28, %v4082_v49  ;;  %v1908_v49 = vsel %vm278_vm8, %v1899_v55, 0  ;;  %v2066_v13 = vpop.permute.xlu1 %2065 }
0x10e1   :  { %v3392_v31 = vpop.eup %3391 }
0x10e2   :  { %v3394_v44 = vpop.eup %3393  ;;  %v1716_v45 = vmul.f32 %v3392_v31, %v4086_v34 }
0x10e3   :  { %v1715_v1 = vmul.f32 %v3394_v44, %v4088_v20 }
0x10e5   :  { %v3396_v3 = vpop.eup %3395  ;;  %v1718_v7 = vpack.c.bf16 %v1716_v45, %v1715_v1 }
0x10e6   :  { %v1821_v25 = vmul.f32 %v3396_v3, %v4098_v27  ;;  %v3398_v50 = vpop.eup %3397 }
0x10e7   :  { %v1717_v34 = vmul.f32 %v3398_v50, %v4076_v30 }
0x10e8   :  { %v1823_v8 = vpack.c.bf16 %v1821_v25, %v1820_v29 }
0x10e9   :  { %v1719_v20 = vpack.c.bf16 %v1717_v34, %v1717_v34 }
0x10ea   :  { %3126 = vmatprep.mubr.msk.bf16.mxu0 %vm507_vm10, %v1823_v8 }
0x10eb   :  { %3127 = vmatmul.mubr.msk.bf16.vlgmr.msra.gmra.mrb[32].mxu0 %vm507_vm10, %v1824_v52 }
0x10ec   :  { %3131 = vmatpush3.bf16.msra.mxu0 %v4091_v10  ;;  %3134 = vmatprep.mubr.msk.bf16.mxu0 %vm507_vm10, %v1718_v7  ;;  %v2077_v10 = vsel %vm278_vm8, %v2068_v57, 0 }
0x10ed   :  { %3243 = vmatprep.subr.msk.bf16.mxu0 %vm278_vm8, %v1899_v55 }
0x10f0   :  { %3133 = vmatpush3.bf16.msra.mxu0 %v1908_v49 }
0x10f1   :  { %3146 = vmatprep.subr.bf16.mxu0 %v2066_v13 }
0x10f7   :  { %3135 = vmatmul.mubr.msk.bf16.vlgmr.msra.gmra.mrb[32].mxu0 %vm507_vm10, %v1719_v20 }
0x10f8   :  { %3147 = vmatpush3.bf16.msra.mxu0 %v2066_v13 }
0x10f9   :  { %3246 = vmatprep.subr.msk.bf16.mxu0 %vm278_vm8, %v2068_v57  ;;  %v3283_v57 = vld [vmem:[#allocation2 + $0x98] sm:$0xff]  }
0x10fa   :  { %3178 = vmatprep.subr.bf16.mxu1 %v3283_v57 }
0x10fb   :  { %3179 = vmatpush3.bf16.msra.mxu1 %v3283_v57 }
0x10fc   :  { %3149 = vmatpush3.bf16.msra.mxu0 %v2077_v10  ;;  %v3284_v10 = vld [vmem:[#allocation2 + $0xa0] sm:$0xff]  }
0x10fd   :  { %3180 = vmatprep.subr.bf16.mxu1 %v3284_v10 }
0x10ff   :  { %3181 = vmatpush3.bf16.msra.mxu1 %v3284_v10 }
0x110f   :  { %v2049_v27 = vpop.xlane.xlu1 %2048 }
0x1110   :  { %3399 = vrcp.f32 %v2049_v27 }
0x1113   :  { %v2043_v46 = vpop.xlane.xlu1 %2042 }
0x1114   :  { %3401 = vrcp.f32 %v2043_v46 }
0x1115   :  { %v2221_v2 = vpop.xlane.xlu0 %2220 }
0x1117   :  { %v2046_v18 = vpop.xlane.xlu1 %2045 }
0x1118   :  { %3403 = vrcp.f32 %v2046_v18 }
0x1119   :  { %v2215_v59 = vpop.xlane.xlu0 %2214 }
0x111a   :  { %3405 = vrcp.f32 %v2215_v59  ;;  %v3400_v62 = vpop.eup %3399 }
0x111b   :  { %v2218_v30 = vpop.xlane.xlu1 %2217  ;;  %v2055_v0 = vmul.f32 %v3400_v62, %v4116_v51  ;;  %v3281_v51 = vld [vmem:[#allocation2 + $0x88] sm:$0xff]  }
0x111c   :  { %3407 = vrcp.f32 %v2218_v30 }
0x111d   :  { %3409 = vrcp.f32 %v2221_v2  ;;  %v2057_v48 = vpack.c.bf16 %v2055_v0, %v2055_v0  ;;  %v2240_v5 = vpop.permute.xlu0 %2239  ;;  %v2850_v0 = vld [vmem:[#allocation5 + $0x44] ss:$0 sm:$0xff] }
0x111e   :  { %v3402_v61 = vpop.eup %3401 }
0x111f   :  { %v2238_v63 = vpop.permute.xlu1 %2237  ;;  %v2053_v43 = vmul.f32 %v3402_v61, %v4120_v12 }
0x1120   :  { %3162 = vmatprep.subr.bf16.mxu0 %v2238_v63 }
0x1122   :  { %v3404_v24 = vpop.eup %3403 }
0x1123   :  { %v2054_v36 = vmul.f32 %v3404_v24, %v4122_v56  ;;  %v2249_v56 = vsel %vm278_vm8, %v2240_v5, 0 }
0x1124   :  { %v3406_v37 = vpop.eup %3405 }
0x1125   :  { %v2056_v40 = vpack.c.bf16 %v2054_v36, %v2053_v43  ;;  %v2225_v42 = vmul.f32 %v3406_v37, %v4134_v21 }
0x1126   :  { %v3408_v41 = vpop.eup %3407 }
0x1127   :  { %3150 = vmatprep.mubr.msk.bf16.mxu0 %vm507_vm10, %v2056_v40  ;;  %v2226_v38 = vmul.f32 %v3408_v41, %v4130_v19  ;;  %v3410_v12 = vpop.eup %3409  ;;  %v3282_v19 = vld [vmem:[#allocation2 + $0x90] sm:$0xff]   ;;  %v2851_v41 = vld [vmem:[#allocation5 + $0x45] ss:$0 sm:$0xff] }
0x1128   :  { %3151 = vmatmul.mubr.msk.bf16.vlgmr.msra.gmra.mrb[32].mxu0 %vm507_vm10, %v2057_v48  ;;  %v2227_v53 = vmul.f32 %v3410_v12, %v4126_v54  ;;  %v2849_v54 = vld [vmem:[#allocation5 + $0x43] ss:$0 sm:$0xff] }
0x1129   :  { %3163 = vmatpush3.bf16.msra.mxu0 %v2238_v63  ;;  %v2228_v9 = vpack.c.bf16 %v2226_v38, %v2225_v42 }
0x112a   :  { %3249 = vmatprep.subr.msk.bf16.mxu0 %vm278_vm8, %v2240_v5  ;;  %v2229_v6 = vpack.c.bf16 %v2227_v53, %v2227_v53 }
0x112b   :  { %3166 = vmatprep.mubr.msk.bf16.mxu0 %vm507_vm10, %v2228_v9 }
0x112d   :  { %3165 = vmatpush3.bf16.msra.mxu0 %v2249_v56 }
0x112e   :  { %3170 = vmatprep.subr.bf16.mxu0 %v3281_v51 }
0x1134   :  { %3167 = vmatmul.mubr.msk.bf16.vlgmr.msra.gmra.mrb[32].mxu0 %vm507_vm10, %v2229_v6  ;;  %v3285_v6 = vld [vmem:[#allocation2 + $0xa8] sm:$0xff]  }
0x1135   :  { %3171 = vmatpush3.bf16.msra.mxu0 %v3281_v51 }
0x1136   :  { %3172 = vmatprep.subr.bf16.mxu0 %v3282_v19 }
0x1139   :  { %3173 = vmatpush3.bf16.msra.mxu0 %v3282_v19  ;;  %v3286_v19 = vld [vmem:[#allocation2 + $0xb0] sm:$0xff]  }
0x113a   :  { %3186 = vmatprep.subr.bf16.mxu0 %v3285_v6 }
0x1207   :  { %v3168_v60 = vpop.f32.mrb[32].mxu0 }
0x1208   :  { %v2285_v21 = vpop.f32.mrb[33].mxu0  ;;  %v2303_v33 = vpack.c.bf16 %v3168_v60, %v3168_v60  ;;  %v2852_v60 = vld [vmem:[#allocation5 + $0x46] ss:$0 sm:$0xff] }
0x1209   :  { %v3169_v14 = vpop.f32.mrb[34].mxu0 }
0x120a   :  { %v2288_v17 = vpop.f32.mrb[35].mxu0 }
0x120b   :  { %v2302_v32 = vpack.c.bf16 %v2288_v17, %v2285_v21 }
0x120d   :  { %3174 = vmatprep.mubr.msk.bf16.mxu0 %vm294_vm6, %v2302_v32 }
0x120e   :  { %3175 = vmatmul.mubr.msk.bf16.vlgmr.msra.gmra.mrb[36].mxu0 %vm294_vm6, %v2303_v33 }
0x120f   :  { %3187 = vmatpush3.bf16.xpose.msra.mxu0 %v3285_v6 }
0x1210   :  { %3188 = vmatprep.subr.bf16.mxu0 %v3286_v19 }
0x1217   :  { %3189 = vmatpush3.bf16.xpose.msra.mxu0 %v3286_v19 }
0x12e1   :  { %v3176_v55 = vpop.f32.mrb[36].mxu0 }
0x12e2   :  { %v2360_v16 = vpop.f32.mrb[37].mxu0  ;;  %v2376_v26 = vadd.f32 %v3176_v55, %v3923_v15 }
0x12e3   :  { %v2374_v23 = vadd.f32 %v2360_v16, %v3920_v39  ;;  %v3177_v11 = vpop.f32.mrb[38].mxu0 }
0x12e4   :  { %v2363_v47 = vpop.f32.mrb[39].mxu0  ;;  %v4185_v44 = vadd.f32 %v2849_v54, %v2376_v26 }
0x12e5   :  { %v4178_v4 = vadd.f32 %v2849_v54, %v2374_v23  ;;  %v2375_v35 = vadd.f32 %v2363_v47, %v3925_v22 }
0x12e6   :  { %v2393_v39 = vsel %vm294_vm6, %v4185_v44, 0.0 }
0x12e7   :  { %v4181_v28 = vadd.f32 %v2849_v54, %v2375_v35  ;;  %v2387_v31 = vsel %vm294_vm6, %v4178_v4, 0.0 }
0x12e8   :  { %2388 = vadd.xlane.f32.xlu1 %v2387_v31 }
0x12e9   :  { %v2390_v3 = vsel %vm294_vm6, %v4181_v28, 0.0 }
0x12ea   :  { %2391 = vadd.xlane.f32.xlu0 %v2390_v3 }
0x12ee   :  { %2394 = vadd.xlane.f32.xlu0 %v2393_v39 }
0x1375   :  { %v2389_v15 = vpop.xlane.xlu1 %2388 }
0x1376   :  { %v2396_v58 = vmul.f32 0.03125, %v2389_v15 }
0x1377   :  { %v2392_v29 = vpop.xlane.xlu0 %2391 }
0x1378   :  { %v2399_v22 = vsub.f32 %v4178_v4, %v2396_v58  ;;  %v2397_v25 = vmul.f32 0.03125, %v2392_v29 }
0x137a   :  { %v2400_v1 = vsub.f32 %v4181_v28, %v2397_v25  ;;  %v2402_v45 = vmul.f32 %v2399_v22, %v2399_v22 }
0x137b   :  { %v2395_v8 = vpop.xlane.xlu0 %2394 }
0x137c   :  { %v2398_v52 = vmul.f32 0.03125, %v2395_v8  ;;  %v2405_v7 = vsel %vm294_vm6, %v2402_v45, 0.0  ;;  %v2403_v50 = vmul.f32 %v2400_v1, %v2400_v1 }
0x137d   :  { %2406 = vadd.xlane.f32.xlu1 %v2405_v7 }
0x137e   :  { %v2401_v49 = vsub.f32 %v4185_v44, %v2398_v52  ;;  %v2408_v13 = vsel %vm294_vm6, %v2403_v50, 0.0 }
0x137f   :  { %2409 = vadd.xlane.f32.xlu0 %v2408_v13 }
0x1380   :  { %v2404_v34 = vmul.f32 %v2401_v49, %v2401_v49 }
0x1382   :  { %v2411_v20 = vsel %vm294_vm6, %v2404_v34, 0.0 }
0x1383   :  { %2412 = vadd.xlane.f32.xlu1 %v2411_v20 }
0x140a   :  { %v2407_v27 = vpop.xlane.xlu1 %2406 }
0x140b   :  { %v2414_v46 = vmul.f32 0.03125, %v2407_v27 }
0x140c   :  { %v2410_v2 = vpop.xlane.xlu0 %2409 }
0x140d   :  { %v2417_v18 = vadd.f32 1e-05, %v2414_v46  ;;  %v2415_v59 = vmul.f32 0.03125, %v2410_v2 }
0x140f   :  { %3411 = vrsqrt.f32 %v2417_v18  ;;  %v2418_v30 = vadd.f32 1e-05, %v2415_v59  ;;  %v2859_v59 = vld [vmem:[#allocation5 + $0x47] ss:$0 sm:$0xff] }
0x1410   :  { %v2413_v62 = vpop.xlane.xlu1 %2412 }
0x1411   :  { %3413 = vrsqrt.f32 %v2418_v30  ;;  %v2416_v63 = vmul.f32 0.03125, %v2413_v62 }
0x1413   :  { %v2419_v61 = vadd.f32 1e-05, %v2416_v63 }
0x1415   :  { %3415 = vrsqrt.f32 %v2419_v61 }
0x1419   :  { %v3412_v24 = vpop.eup %3411 }
0x141a   :  { %v2423_v43 = vmul.f32 %v3412_v24, %v2399_v22 }
0x141b   :  { %v3414_v36 = vpop.eup %3413 }
0x141c   :  { %v2424_v37 = vmul.f32 %v3414_v36, %v2400_v1  ;;  %v2430_v40 = vmul.f32 %v2850_v0, %v2423_v43 }
0x141e   :  { %v2431_v48 = vmul.f32 %v2850_v0, %v2424_v37  ;;  %v2437_v5 = vadd.f32 %v2851_v41, %v2430_v40 }
0x141f   :  { %v3416_v42 = vpop.eup %3415 }
0x1420   :  { %v2425_v38 = vmul.f32 %v3416_v42, %v2401_v49  ;;  %v2438_v9 = vadd.f32 %v2851_v41, %v2431_v48 }
0x1422   :  { %v2440_v51 = vpack.c.bf16 %v2438_v9, %v2437_v5  ;;  %v2432_v12 = vmul.f32 %v2850_v0, %v2425_v38 }
0x1424   :  { %3182 = vmatprep.mubr.msk.bf16.mxu1 %vm294_vm6, %v2440_v51  ;;  %v2439_v56 = vadd.f32 %v2851_v41, %v2432_v12 }
0x1426   :  { %v2441_v53 = vpack.c.bf16 %v2439_v56, %v2439_v56 }
0x1428   :  { %3183 = vmatmul.mubr.msk.bf16.vlgmr.msra.gmra.mrb[36].mxu1 %vm294_vm6, %v2441_v53 }
0x14fb   :  { %v3184_v21 = vpop.f32.mrb[36].mxu1 }
0x14fc   :  { %v2512_v14 = vadd.f32 %v3184_v21, %v2852_v60  ;;  %v2503_v17 = vpop.f32.mrb[37].mxu1 }
0x14fd   :  { %v2504_v32 = vadd.f32 %v2852_v60, %v2503_v17  ;;  %v3185_v33 = vpop.f32.mrb[38].mxu1  ;;  %v3288_v17 = vld [vmem:[#allocation2 + $0x30] sm:$0xff]  }
0x14fe   :  { %v2522_v55 = vmul.f32 %v2512_v14, %v2512_v14  ;;  %v2506_v54 = vpop.f32.mrb[39].mxu1  ;;  %v2519_v49 = vmul.f32 0.5, %v2512_v14 }
0x14ff   :  { %v2520_v16 = vmul.f32 %v2504_v32, %v2504_v32  ;;  %v2507_v23 = vadd.f32 %v2852_v60, %v2506_v54  ;;  %v2517_v13 = vmul.f32 0.5, %v2504_v32 }
0x1500   :  { %v2525_v11 = vmul.f32 %v2522_v55, %v2512_v14 }
0x1501   :  { %v2523_v47 = vmul.f32 %v2520_v16, %v2504_v32  ;;  %v2521_v26 = vmul.f32 %v2507_v23, %v2507_v23  ;;  %v2518_v34 = vmul.f32 0.5, %v2507_v23 }
0x1502   :  { %v2528_v35 = vmul.f32 0.044715, %v2525_v11 }
0x1503   :  { %v2526_v31 = vmul.f32 0.044715, %v2523_v47  ;;  %v2524_v3 = vmul.f32 %v2521_v26, %v2507_v23 }
0x1504   :  { %v2531_v39 = vadd.f32 %v2528_v35, %v2512_v14  ;;  %v3287_v14 = vld [vmem:[#allocation2 + $0x28] sm:$0xff]  }
0x1505   :  { %v2529_v15 = vadd.f32 %v2526_v31, %v2504_v32  ;;  %v2527_v58 = vmul.f32 0.044715, %v2524_v3  ;;  %3194 = vmatprep.subr.bf16.mxu1 %v3287_v14  ;;  %v2860_v31 = vld [vmem:[#allocation5 + $0x36] ss:$0 sm:$0xff] }
0x1506   :  { %v2534_v29 = vmul.f32 0.7978846, %v2531_v39  ;;  %3195 = vmatpush3.bf16.msra.mxu1 %v3287_v14 }
0x1507   :  { %v2532_v22 = vmul.f32 0.7978846, %v2529_v15  ;;  %v2530_v25 = vadd.f32 %v2527_v58, %v2507_v23  ;;  %3196 = vmatprep.subr.bf16.mxu1 %v3288_v17 }
0x1508   :  { %3417 = vtanh.f32 %v2534_v29 }
0x1509   :  { %3419 = vtanh.f32 %v2532_v22  ;;  %v2533_v1 = vmul.f32 0.7978846, %v2530_v25  ;;  %v2861_v22 = vld [vmem:[#allocation5 + $0x37] ss:$0 sm:$0xff] }
0x150a   :  { %3197 = vmatpush3.bf16.msra.mxu1 %v3288_v17 }
0x150b   :  { %3421 = vtanh.f32 %v2533_v1 }
0x1512   :  { %v3418_v45 = vpop.eup %3417 }
0x1513   :  { %v3420_v8 = vpop.eup %3419  ;;  %v2540_v52 = vadd.f32 1.0, %v3418_v45 }
0x1514   :  { %v2538_v7 = vadd.f32 1.0, %v3420_v8 }
0x1515   :  { %v3422_v50 = vpop.eup %3421  ;;  %v2543_v57 = vmul.f32 %v2540_v52, %v2519_v49 }
0x1516   :  { %v2539_v20 = vadd.f32 1.0, %v3422_v50  ;;  %v2541_v10 = vmul.f32 %v2538_v7, %v2517_v13 }
0x1517   :  { %v2545_v2 = vpack.c.bf16 %v2543_v57, %v2543_v57 }
0x1518   :  { %v2542_v27 = vmul.f32 %v2539_v20, %v2518_v34 }
0x151a   :  { %v2544_v46 = vpack.c.bf16 %v2542_v27, %v2541_v10 }
0x151c   :  { %3190 = vmatprep.mubr.bf16.mxu0 %v2544_v46 }
0x151d   :  { %3191 = vmatmul.mubr.bf16.vlgmr.msra.gmra.mrb[40].mxu0 %v2545_v2 }
0x15f0   :  { %v3192_v18 = vpop.f32.mrb[40].mxu0 }
0x15f1   :  { %v2596_v30 = vpop.f32.mrb[41].mxu0  ;;  %v2612_v62 = vadd.f32 %v3192_v18, %v4185_v44 }
0x15f2   :  { %v2610_v63 = vadd.f32 %v2596_v30, %v4178_v4  ;;  %v3193_v61 = vpop.f32.mrb[42].mxu0 }
0x15f3   :  { %v2599_v24 = vpop.f32.mrb[43].mxu0  ;;  %v2620_v36 = vadd.f32 %v2859_v59, %v2612_v62 }
0x15f4   :  { %v2618_v0 = vadd.f32 %v2859_v59, %v2610_v63  ;;  %v2611_v43 = vadd.f32 %v2599_v24, %v4181_v28 }
0x15f5   :  { %v2629_v48 = vsel %vm294_vm6, %v2620_v36, 0.0 }
0x15f6   :  { %v2619_v37 = vadd.f32 %v2859_v59, %v2611_v43  ;;  %v2623_v40 = vsel %vm294_vm6, %v2618_v0, 0.0 }
0x15f7   :  { %2624 = vadd.xlane.f32.xlu0 %v2623_v40 }
0x15f8   :  { %v2626_v41 = vsel %vm294_vm6, %v2619_v37, 0.0 }
0x15f9   :  { %2627 = vadd.xlane.f32.xlu1 %v2626_v41 }
0x15fb   :  { %2630 = vadd.xlane.f32.xlu0 %v2629_v48 }
0x1684   :  { %v2625_v42 = vpop.xlane.xlu0 %2624 }
0x1685   :  { %v2632_v44 = vmul.f32 0.03125, %v2625_v42 }
0x1686   :  { %v2628_v38 = vpop.xlane.xlu1 %2627 }
0x1687   :  { %v2635_v4 = vsub.f32 %v2618_v0, %v2632_v44  ;;  %v2633_v5 = vmul.f32 0.03125, %v2628_v38 }
0x1688   :  { %v2631_v9 = vpop.xlane.xlu0 %2630 }
0x1689   :  { %v2636_v51 = vsub.f32 %v2619_v37, %v2633_v5  ;;  %v2634_v12 = vmul.f32 0.03125, %v2631_v9  ;;  %v2638_v28 = vmul.f32 %v2635_v4, %v2635_v4 }
0x168b   :  { %v2637_v56 = vsub.f32 %v2620_v36, %v2634_v12  ;;  %v2641_v53 = vsel %vm294_vm6, %v2638_v28, 0.0  ;;  %v2639_v6 = vmul.f32 %v2636_v51, %v2636_v51 }
0x168c   :  { %2642 = vadd.xlane.f32.xlu1 %v2641_v53 }
0x168d   :  { %v2644_v19 = vsel %vm294_vm6, %v2639_v6, 0.0  ;;  %v2640_v60 = vmul.f32 %v2637_v56, %v2637_v56 }
0x168e   :  { %2645 = vadd.xlane.f32.xlu0 %v2644_v19 }
0x168f   :  { %v2647_v21 = vsel %vm294_vm6, %v2640_v60, 0.0 }
0x1690   :  { %2648 = vadd.xlane.f32.xlu1 %v2647_v21 }
0x1719   :  { %v2643_v32 = vpop.xlane.xlu1 %2642 }
0x171a   :  { %v2650_v33 = vmul.f32 0.03125, %v2643_v32 }
0x171b   :  { %v2646_v55 = vpop.xlane.xlu0 %2645 }
0x171c   :  { %v2653_v54 = vadd.f32 1e-05, %v2650_v33  ;;  %v2651_v16 = vmul.f32 0.03125, %v2646_v55 }
0x171d   :  { %v2649_v23 = vpop.xlane.xlu1 %2648 }
0x171e   :  { %3423 = vrsqrt.f32 %v2653_v54  ;;  %v2654_v11 = vadd.f32 1e-05, %v2651_v16  ;;  %v2652_v47 = vmul.f32 0.03125, %v2649_v23 }
0x1720   :  { %3425 = vrsqrt.f32 %v2654_v11  ;;  %v2655_v26 = vadd.f32 1e-05, %v2652_v47 }
0x1722   :  { %3427 = vrsqrt.f32 %v2655_v26 }
0x1728   :  { %v3424_v35 = vpop.eup %3423 }
0x1729   :  { %v2659_v3 = vmul.f32 %v3424_v35, %v2635_v4 }
0x172a   :  { %v3426_v39 = vpop.eup %3425 }
0x172b   :  { %v2660_v15 = vmul.f32 %v3426_v39, %v2636_v51  ;;  %v2666_v58 = vmul.f32 %v2860_v31, %v2659_v3 }
0x172c   :  { %v3428_v29 = vpop.eup %3427 }
0x172d   :  { %v2661_v25 = vmul.f32 %v3428_v29, %v2637_v56  ;;  %v2667_v1 = vmul.f32 %v2860_v31, %v2660_v15  ;;  %v2673_v8 = vadd.f32 %v2861_v22, %v2666_v58 }
0x172f   :  { %v2668_v45 = vmul.f32 %v2860_v31, %v2661_v25  ;;  %v2674_v52 = vadd.f32 %v2861_v22, %v2667_v1 }
0x1731   :  { %v2676_v7 = vpack.c.bf16 %v2674_v52, %v2673_v8  ;;  %v2675_v50 = vadd.f32 %v2861_v22, %v2668_v45 }
0x1733   :  { %3198 = vmatprep.mubr.msk.bf16.mxu1 %vm294_vm6, %v2676_v7  ;;  %v2677_v49 = vpack.c.bf16 %v2675_v50, %v2675_v50 }
0x1735   :  { %3199 = vmatmul.mubr.msk.bf16.vlgmr.msra.gmra.mrb[40].mxu1 %vm294_vm6, %v2677_v49 }
0x1808   :  { %v3200_v13 = vpop.f32.mrb[40].mxu1 }
0x1809   :  { %2750 = vst [vmem:[#allocation7 + $0x10] sm:$0xff] %v3200_v13  ;;  %v2734_v34 = vpop.f32.mrb[41].mxu1 }
0x180a   :  { %2748 = vst [vmem:[#allocation7] sm:$0xff] %v2734_v34  ;;  %v3201_v20 = vpop.f32.mrb[42].mxu1 }
0x180b   :  { %v2737_v57 = vpop.f32.mrb[43].mxu1 }
0x180c   :  { %2749 = vst [vmem:[#allocation7 + $0x8] sm:$0xff] %v2737_v57 }
0x180d   :  { %3487 = shalt.err (!%p3484_p6)
}
0x180e   :  { %s3488_s26 = scalar_lea.hbm %s4229_s4, 384 }
0x180f   :  { %p3489_p7 = scmp.ne.s32.totalorder %s4229_s4, %s3488_s26  ;;  %p3492_p8 = scmp.lt.u32.totalorder %s3488_s26, %s4229_s4 }
0x1811   :  { %p3494_p9 = pnand %p3492_p8, %p3489_p7 }
0x1813   :  { %3497 = shalt.err (!%p3494_p9)
}
0x1814   :  { %2762 = dma.vmem_to_hbm [thread:$0]  %s2757_s22, 384, %s4229_s4, [#allocation4], %s3508_s2, %s3508_s2, %s3509_s13  }
0x1815   :  { %3502 = dma.done.wait [#allocation4], 384  }
0x1816   :  { %3503 = vsyncadd [#allocation4], 4294966912 }
0x1817   :  { %2766 = vsyncpa [#allocation3], 1 }
0x1818   :  { %2767 = vsyncpa [#allocation6], 1 }
0x1819   :  { %2768 = vsyncpa [#allocation4], 1 }

</bundles_post_ra>
